<compile_context>
chip_gen: v7x
topology: tpu7x:2x2x1
jax: 0.10.0
libtpu: 0.0.40
codegen_flags: <defaults>
</compile_context>

<pallas_src>
import jax
import jax.numpy as jnp
from jax.experimental import pallas as pl
from jax.experimental.pallas import tpu as pltpu


def _critic_fc_kernel(x_ref,
                      w1, b1, w2, b2, w3, b3, w4, b4, w5, b5,
                      w6, b6, w7, b7, w8, b8, w9, b9, w10, b10,
                      o_ref):
    """Fused 10-layer MLP in transposed (features x batch-columns) layout.

    x_ref:  (p*input_size, tbp)   packed input block (p batch rows per column)
    w_l:    (p*out_l, p*in_l)     block-diagonal kron(eye(p), W_l) weights
    b_l:    (p*out_l, 1)          per-feature bias column (f32)
    o_ref:  (8, tbp)              rows [0, p) hold the critic values
    """
    h = x_ref[...]
    hidden_layers = ((w1, b1), (w2, b2), (w3, b3), (w4, b4), (w5, b5),
                     (w6, b6), (w7, b7), (w8, b8), (w9, b9))
    for w_ref, b_ref in hidden_layers:
        # MXU matmul, bf16 (or f32) operands, f32 accumulation.
        a = jnp.dot(w_ref[...], h.astype(w_ref.dtype),
                    preferred_element_type=jnp.float32)
        # Bias + ReLU in f32 on the VPU.
        h = jnp.maximum(a + b_ref[...], 0.0)
    out = jnp.dot(w10[...], h.astype(w10.dtype),
                  preferred_element_type=jnp.float32) + b10[...]
    # Lane-dense (8, tbp) store: unmasked vst, no 1-lane partial-store epilogue.
    o_ref[...] = out.astype(o_ref.dtype)


def critic_fc_forward(state, params, *, block_batch=1024, use_bf16=True,
                      min_pallas_batch=128):
    """state: [B, input_size] f32.  params: list of (W (out,in), b (out,)) per layer."""
    batch, in_dim = state.shape

    # Very small batches: pallas_call fixed overhead + padding dominates; the
    # plain XLA dot chain is as fast or faster.
    if batch < min_pallas_batch:
        return critic_fc_reference(state, params)

    width = params[0][0].shape[0]                 # 2 * hidden_dim
    # Pack p independent batch rows onto the feature (sublane) axis so the
    # middle-layer contraction dim becomes p*width (target: 128).
    p = max(1, min(8, 128 // max(width, 1)))

    # Batch tile (rows). Must be a multiple of p*128 so each block is a whole
    # number of 128-lane columns; keep >= 2 grid steps when the batch allows it
    # so both v7x TensorCores get work from the "parallel" batch axis.
    lane_unit = p * 128
    tb = max(lane_unit, (block_batch // lane_unit) * lane_unit)
    while tb > lane_unit and pl.cdiv(batch, tb) < 2:
        tb = max(lane_unit, (tb // 2 // lane_unit) * lane_unit)

    padded_b = pl.cdiv(batch, tb) * tb
    x = state
    if padded_b != batch:
        x = jnp.pad(x, ((0, padded_b - batch), (0, 0)))

    # Transposed + packed input: column c of x_pk carries batch rows
    # [c, half + c, ..., (p-1)*half + c]; rows are p stacked feature groups.
    half = padded_b // p
    xt = x.T                                                    # (in_dim, padded_b)
    x_pk = jnp.concatenate(
        [xt[:, k * half:(k + 1) * half] for k in range(p)], axis=0)  # (p*in_dim, half)
    if use_bf16:
        x_pk = x_pk.astype(jnp.bfloat16)   # halves input DMA; same MXU numerics

    # Block-diagonal weights / stacked bias columns (built once, VMEM-resident).
    w_dtype = jnp.bfloat16 if use_bf16 else jnp.float32
    eye_p = jnp.eye(p, dtype=jnp.float32)
    flat_args = [x_pk]
    n_layers = len(params)
    for li, (w, b) in enumerate(params):
        w_blk = jnp.kron(eye_p, w.astype(jnp.float32))          # (p*out, p*in)
        b_col = jnp.tile(b.astype(jnp.float32).reshape(1, -1),
                         (p, 1)).reshape(-1, 1)                 # (p*out, 1)
        if li == n_layers - 1 and w_blk.shape[0] < 8:
            # Pad the final (p, p*hidden) layer to 8 output rows so the result
            # block is a clean (8, tbp) tile; extra rows are zero and dropped.
            pad = 8 - w_blk.shape[0]
            w_blk = jnp.pad(w_blk, ((0, pad), (0, 0)))
            b_col = jnp.pad(b_col, ((0, pad), (0, 0)))
        flat_args.append(w_blk.astype(w_dtype))
        flat_args.append(b_col)                                  # biases stay f32

    out_rows = flat_args[-2].shape[0]          # max(p, 8)
    tbp = tb // p                              # lanes (batch columns) per block
    n_blocks = half // tbp

    # Input tiled along the (lane) batch axis; every weight/bias has a constant
    # index_map so it is loaded once and stays VMEM-resident across grid steps.
    in_specs = [pl.BlockSpec((p * in_dim, tbp), lambda i: (0, i))]
    for arr in flat_args[1:]:
        in_specs.append(pl.BlockSpec(arr.shape, lambda i: (0, 0)))
    out_spec = pl.BlockSpec((out_rows, tbp), lambda i: (0, i))

    flops = 2 * padded_b * sum(int(w.shape[0]) * int(w.shape[1]) for w, _ in params)
    bytes_accessed = (int(x_pk.size) * x_pk.dtype.itemsize
                      + out_rows * half * 4
                      + sum(int(a.size) * a.dtype.itemsize for a in flat_args[1:]))
    cost = pl.CostEstimate(flops=flops, transcendentals=0,
                           bytes_accessed=int(bytes_accessed))

    out = pl.pallas_call(
        _critic_fc_kernel,
        out_shape=jax.ShapeDtypeStruct((out_rows, half), jnp.float32),
        grid=(n_blocks,),
        in_specs=in_specs,
        out_specs=out_spec,
        compiler_params=pltpu.CompilerParams(
            dimension_semantics=("parallel",)),
        cost_estimate=cost,
    )(*flat_args)

    # Rows [0, p) flatten back to batch order; slicing [:batch] drops exactly
    # the zero-padded rows.
    return out[:p, :].reshape(padded_b)[:batch].reshape(batch, 1)


def critic_fc_reference(state, params):
    """Pure-JAX reference (PyTorch semantics): relu(x @ W.T + b) x9, linear head."""
    h = state
    for w, b in params[:-1]:
        h = jnp.maximum(h @ w.T + b, 0.0)
    w, b = params[-1]
    return h @ w.T + b


def _orthogonal(key, out_dim, in_dim):
    """Deterministic orthogonal init (like nn.init.orthogonal_)."""
    rows, cols = out_dim, in_dim
    big, small = max(rows, cols), min(rows, cols)
    a = jax.random.normal(key, (big, small), dtype=jnp.float32)
    q, r = jnp.linalg.qr(a)
    q = q * jnp.sign(jnp.diag(r))[None, :]
    if rows < cols:
        q = q.T
    return q[:rows, :cols]


def init_critic_fc_params(key, input_size, hidden_dim):
    """Returns [(W of shape (out,in), b of shape (out,))] for fc1..fc10."""
    dims = [input_size] + [2 * hidden_dim] * 8 + [hidden_dim, 1]
    params = []
    for i in range(10):
        in_d, out_d = dims[i], dims[i + 1]
        key, kw, kb = jax.random.split(key, 3)
        w = _orthogonal(kw, out_d, in_d)                 # (out, in), torch layout
        bound = 1.0 / (in_d ** 0.5)
        b = jax.random.uniform(kb, (out_d,), jnp.float32, -bound, bound)
        params.append((w.astype(jnp.float32), b))
    return params


if __name__ == "__main__":
    key = jax.random.PRNGKey(0)
    input_size, hidden_dim = 16, 32

    key, k_params, k_state = jax.random.split(key, 3)
    params = init_critic_fc_params(k_params, input_size, hidden_dim)

    # 1) Main Pallas path: batch is not a tile multiple (exercises padding) and
    #    large enough for >= 2 grid steps.
    batch = 384
    state = jax.random.normal(k_state, (batch, input_size), dtype=jnp.float32)
    ref = critic_fc_reference(state, params)

    out_bf16 = jax.block_until_ready(critic_fc_forward(state, params))
    assert out_bf16.shape == (batch, 1), out_bf16.shape
    assert jnp.allclose(out_bf16, ref, atol=5e-2, rtol=5e-2), (
        f"bf16 max abs err {jnp.max(jnp.abs(out_bf16 - ref))}")

    out_f32 = jax.block_until_ready(
        critic_fc_forward(state, params, use_bf16=False))
    assert jnp.allclose(out_f32, ref, atol=5e-3, rtol=5e-3), (
        f"f32 max abs err {jnp.max(jnp.abs(out_f32 - ref))}")

    # 2) Forced-Pallas tiny batch: exercises heavy zero-padding / tail handling.
    key, k_state2 = jax.random.split(key)
    batch2 = 10
    state2 = jax.random.normal(k_state2, (batch2, input_size), dtype=jnp.float32)
    out2 = jax.block_until_ready(
        critic_fc_forward(state2, params, min_pallas_batch=0))
    ref2 = critic_fc_reference(state2, params)
    assert out2.shape == (batch2, 1), out2.shape
    assert jnp.allclose(out2, ref2, atol=5e-2, rtol=5e-2), (
        f"max abs err {jnp.max(jnp.abs(out2 - ref2))}")

    # 3) Small-batch pure-XLA fallback path.
    key, k_state3 = jax.random.split(key)
    state3 = jax.random.normal(k_state3, (8, input_size), dtype=jnp.float32)
    out3 = jax.block_until_ready(critic_fc_forward(state3, params))
    assert out3.shape == (8, 1), out3.shape
    assert jnp.allclose(out3, critic_fc_reference(state3, params),
                        atol=1e-4, rtol=1e-4)

    print("KERNEL_OK")
</pallas_src>

<mosaic_0001>
module attributes {stable_mosaic.version = 11 : i64} {
  func.func @_critic_fc_kernel(%arg0: i32, %arg1: memref<32x128xbf16, #tpu.memory_space<vmem>>, %arg2: memref<128x32xbf16, #tpu.memory_space<vmem>>, %arg3: memref<128x1xf32, #tpu.memory_space<vmem>>, %arg4: memref<128x128xbf16, #tpu.memory_space<vmem>>, %arg5: memref<128x1xf32, #tpu.memory_space<vmem>>, %arg6: memref<128x128xbf16, #tpu.memory_space<vmem>>, %arg7: memref<128x1xf32, #tpu.memory_space<vmem>>, %arg8: memref<128x128xbf16, #tpu.memory_space<vmem>>, %arg9: memref<128x1xf32, #tpu.memory_space<vmem>>, %arg10: memref<128x128xbf16, #tpu.memory_space<vmem>>, %arg11: memref<128x1xf32, #tpu.memory_space<vmem>>, %arg12: memref<128x128xbf16, #tpu.memory_space<vmem>>, %arg13: memref<128x1xf32, #tpu.memory_space<vmem>>, %arg14: memref<128x128xbf16, #tpu.memory_space<vmem>>, %arg15: memref<128x1xf32, #tpu.memory_space<vmem>>, %arg16: memref<128x128xbf16, #tpu.memory_space<vmem>>, %arg17: memref<128x1xf32, #tpu.memory_space<vmem>>, %arg18: memref<64x128xbf16, #tpu.memory_space<vmem>>, %arg19: memref<64x1xf32, #tpu.memory_space<vmem>>, %arg20: memref<8x64xbf16, #tpu.memory_space<vmem>>, %arg21: memref<8x1xf32, #tpu.memory_space<vmem>>, %arg22: memref<8x128xf32, #tpu.memory_space<vmem>>) attributes {dimension_semantics = [#tpu.dimension_semantics<parallel>], iteration_bounds = array<i64: 2>, scalar_prefetch = 0 : i64, scratch_operands = 0 : i64, tpu.core_type = #tpu.core_type<tc>, window_params = [{transform_indices = @transform_0, window_bounds = array<i64: 32, 128>}, {pipeline_mode = #tpu.pipeline_mode<synchronous>, transform_indices = @transform_1, window_bounds = array<i64: 128, 32>}, {pipeline_mode = #tpu.pipeline_mode<synchronous>, transform_indices = @transform_2, window_bounds = array<i64: 128, 1>}, {pipeline_mode = #tpu.pipeline_mode<synchronous>, transform_indices = @transform_3, window_bounds = array<i64: 128, 128>}, {pipeline_mode = #tpu.pipeline_mode<synchronous>, transform_indices = @transform_4, window_bounds = array<i64: 128, 1>}, {pipeline_mode = #tpu.pipeline_mode<synchronous>, transform_indices = @transform_5, window_bounds = array<i64: 128, 128>}, {pipeline_mode = #tpu.pipeline_mode<synchronous>, transform_indices = @transform_6, window_bounds = array<i64: 128, 1>}, {pipeline_mode = #tpu.pipeline_mode<synchronous>, transform_indices = @transform_7, window_bounds = array<i64: 128, 128>}, {pipeline_mode = #tpu.pipeline_mode<synchronous>, transform_indices = @transform_8, window_bounds = array<i64: 128, 1>}, {pipeline_mode = #tpu.pipeline_mode<synchronous>, transform_indices = @transform_9, window_bounds = array<i64: 128, 128>}, {pipeline_mode = #tpu.pipeline_mode<synchronous>, transform_indices = @transform_10, window_bounds = array<i64: 128, 1>}, {pipeline_mode = #tpu.pipeline_mode<synchronous>, transform_indices = @transform_11, window_bounds = array<i64: 128, 128>}, {pipeline_mode = #tpu.pipeline_mode<synchronous>, transform_indices = @transform_12, window_bounds = array<i64: 128, 1>}, {pipeline_mode = #tpu.pipeline_mode<synchronous>, transform_indices = @transform_13, window_bounds = array<i64: 128, 128>}, {pipeline_mode = #tpu.pipeline_mode<synchronous>, transform_indices = @transform_14, window_bounds = array<i64: 128, 1>}, {pipeline_mode = #tpu.pipeline_mode<synchronous>, transform_indices = @transform_15, window_bounds = array<i64: 128, 128>}, {pipeline_mode = #tpu.pipeline_mode<synchronous>, transform_indices = @transform_16, window_bounds = array<i64: 128, 1>}, {pipeline_mode = #tpu.pipeline_mode<synchronous>, transform_indices = @transform_17, window_bounds = array<i64: 64, 128>}, {pipeline_mode = #tpu.pipeline_mode<synchronous>, transform_indices = @transform_18, window_bounds = array<i64: 64, 1>}, {pipeline_mode = #tpu.pipeline_mode<synchronous>, transform_indices = @transform_19, window_bounds = array<i64: 8, 64>}, {pipeline_mode = #tpu.pipeline_mode<synchronous>, transform_indices = @transform_20, window_bounds = array<i64: 8, 1>}, {transform_indices = @transform_21, window_bounds = array<i64: 8, 128>}]} {
    %c0 = arith.constant 0 : index
    %c0_0 = arith.constant 0 : index
    %0 = vector.load %arg1[%c0, %c0_0] : memref<32x128xbf16, #tpu.memory_space<vmem>>, vector<32x128xbf16>
    %c0_1 = arith.constant 0 : index
    %c0_2 = arith.constant 0 : index
    %1 = vector.load %arg2[%c0_1, %c0_2] : memref<128x32xbf16, #tpu.memory_space<vmem>>, vector<128x32xbf16>
    %cst = arith.constant dense<0.000000e+00> : vector<128x128xf32>
    %2 = tpu.matmul %1, %0, %cst {dimension_numbers = #tpu.dot_dimension_numbers<[1], [0], [0], [1], [0, 0, 1, 1], [], []>} : vector<128x32xbf16>, vector<32x128xbf16>, vector<128x128xf32> -> vector<128x128xf32>
    %c0_3 = arith.constant 0 : index
    %c0_4 = arith.constant 0 : index
    %3 = vector.load %arg3[%c0_3, %c0_4] : memref<128x1xf32, #tpu.memory_space<vmem>>, vector<128x1xf32>
    %4 = vector.broadcast %3 : vector<128x1xf32> to vector<128x128xf32>
    %5 = arith.addf %2, %4 : vector<128x128xf32>
    %cst_5 = arith.constant 0.000000e+00 : f32
    %6 = vector.broadcast %cst_5 : f32 to vector<128x128xf32>
    %7 = arith.maximumf %5, %6 : vector<128x128xf32>
    %c0_6 = arith.constant 0 : index
    %c0_7 = arith.constant 0 : index
    %8 = vector.load %arg4[%c0_6, %c0_7] : memref<128x128xbf16, #tpu.memory_space<vmem>>, vector<128x128xbf16>
    %9 = arith.truncf %7 : vector<128x128xf32> to vector<128x128xbf16>
    %cst_8 = arith.constant dense<0.000000e+00> : vector<128x128xf32>
    %10 = tpu.matmul %8, %9, %cst_8 {dimension_numbers = #tpu.dot_dimension_numbers<[1], [0], [0], [1], [0, 0, 1, 1], [], []>} : vector<128x128xbf16>, vector<128x128xbf16>, vector<128x128xf32> -> vector<128x128xf32>
    %c0_9 = arith.constant 0 : index
    %c0_10 = arith.constant 0 : index
    %11 = vector.load %arg5[%c0_9, %c0_10] : memref<128x1xf32, #tpu.memory_space<vmem>>, vector<128x1xf32>
    %12 = vector.broadcast %11 : vector<128x1xf32> to vector<128x128xf32>
    %13 = arith.addf %10, %12 : vector<128x128xf32>
    %cst_11 = arith.constant 0.000000e+00 : f32
    %14 = vector.broadcast %cst_11 : f32 to vector<128x128xf32>
    %15 = arith.maximumf %13, %14 : vector<128x128xf32>
    %c0_12 = arith.constant 0 : index
    %c0_13 = arith.constant 0 : index
    %16 = vector.load %arg6[%c0_12, %c0_13] : memref<128x128xbf16, #tpu.memory_space<vmem>>, vector<128x128xbf16>
    %17 = arith.truncf %15 : vector<128x128xf32> to vector<128x128xbf16>
    %cst_14 = arith.constant dense<0.000000e+00> : vector<128x128xf32>
    %18 = tpu.matmul %16, %17, %cst_14 {dimension_numbers = #tpu.dot_dimension_numbers<[1], [0], [0], [1], [0, 0, 1, 1], [], []>} : vector<128x128xbf16>, vector<128x128xbf16>, vector<128x128xf32> -> vector<128x128xf32>
    %c0_15 = arith.constant 0 : index
    %c0_16 = arith.constant 0 : index
    %19 = vector.load %arg7[%c0_15, %c0_16] : memref<128x1xf32, #tpu.memory_space<vmem>>, vector<128x1xf32>
    %20 = vector.broadcast %19 : vector<128x1xf32> to vector<128x128xf32>
    %21 = arith.addf %18, %20 : vector<128x128xf32>
    %cst_17 = arith.constant 0.000000e+00 : f32
    %22 = vector.broadcast %cst_17 : f32 to vector<128x128xf32>
    %23 = arith.maximumf %21, %22 : vector<128x128xf32>
    %c0_18 = arith.constant 0 : index
    %c0_19 = arith.constant 0 : index
    %24 = vector.load %arg8[%c0_18, %c0_19] : memref<128x128xbf16, #tpu.memory_space<vmem>>, vector<128x128xbf16>
    %25 = arith.truncf %23 : vector<128x128xf32> to vector<128x128xbf16>
    %cst_20 = arith.constant dense<0.000000e+00> : vector<128x128xf32>
    %26 = tpu.matmul %24, %25, %cst_20 {dimension_numbers = #tpu.dot_dimension_numbers<[1], [0], [0], [1], [0, 0, 1, 1], [], []>} : vector<128x128xbf16>, vector<128x128xbf16>, vector<128x128xf32> -> vector<128x128xf32>
    %c0_21 = arith.constant 0 : index
    %c0_22 = arith.constant 0 : index
    %27 = vector.load %arg9[%c0_21, %c0_22] : memref<128x1xf32, #tpu.memory_space<vmem>>, vector<128x1xf32>
    %28 = vector.broadcast %27 : vector<128x1xf32> to vector<128x128xf32>
    %29 = arith.addf %26, %28 : vector<128x128xf32>
    %cst_23 = arith.constant 0.000000e+00 : f32
    %30 = vector.broadcast %cst_23 : f32 to vector<128x128xf32>
    %31 = arith.maximumf %29, %30 : vector<128x128xf32>
    %c0_24 = arith.constant 0 : index
    %c0_25 = arith.constant 0 : index
    %32 = vector.load %arg10[%c0_24, %c0_25] : memref<128x128xbf16, #tpu.memory_space<vmem>>, vector<128x128xbf16>
    %33 = arith.truncf %31 : vector<128x128xf32> to vector<128x128xbf16>
    %cst_26 = arith.constant dense<0.000000e+00> : vector<128x128xf32>
    %34 = tpu.matmul %32, %33, %cst_26 {dimension_numbers = #tpu.dot_dimension_numbers<[1], [0], [0], [1], [0, 0, 1, 1], [], []>} : vector<128x128xbf16>, vector<128x128xbf16>, vector<128x128xf32> -> vector<128x128xf32>
    %c0_27 = arith.constant 0 : index
    %c0_28 = arith.constant 0 : index
    %35 = vector.load %arg11[%c0_27, %c0_28] : memref<128x1xf32, #tpu.memory_space<vmem>>, vector<128x1xf32>
    %36 = vector.broadcast %35 : vector<128x1xf32> to vector<128x128xf32>
    %37 = arith.addf %34, %36 : vector<128x128xf32>
    %cst_29 = arith.constant 0.000000e+00 : f32
    %38 = vector.broadcast %cst_29 : f32 to vector<128x128xf32>
    %39 = arith.maximumf %37, %38 : vector<128x128xf32>
    %c0_30 = arith.constant 0 : index
    %c0_31 = arith.constant 0 : index
    %40 = vector.load %arg12[%c0_30, %c0_31] : memref<128x128xbf16, #tpu.memory_space<vmem>>, vector<128x128xbf16>
    %41 = arith.truncf %39 : vector<128x128xf32> to vector<128x128xbf16>
    %cst_32 = arith.constant dense<0.000000e+00> : vector<128x128xf32>
    %42 = tpu.matmul %40, %41, %cst_32 {dimension_numbers = #tpu.dot_dimension_numbers<[1], [0], [0], [1], [0, 0, 1, 1], [], []>} : vector<128x128xbf16>, vector<128x128xbf16>, vector<128x128xf32> -> vector<128x128xf32>
    %c0_33 = arith.constant 0 : index
    %c0_34 = arith.constant 0 : index
    %43 = vector.load %arg13[%c0_33, %c0_34] : memref<128x1xf32, #tpu.memory_space<vmem>>, vector<128x1xf32>
    %44 = vector.broadcast %43 : vector<128x1xf32> to vector<128x128xf32>
    %45 = arith.addf %42, %44 : vector<128x128xf32>
    %cst_35 = arith.constant 0.000000e+00 : f32
    %46 = vector.broadcast %cst_35 : f32 to vector<128x128xf32>
    %47 = arith.maximumf %45, %46 : vector<128x128xf32>
    %c0_36 = arith.constant 0 : index
    %c0_37 = arith.constant 0 : index
    %48 = vector.load %arg14[%c0_36, %c0_37] : memref<128x128xbf16, #tpu.memory_space<vmem>>, vector<128x128xbf16>
    %49 = arith.truncf %47 : vector<128x128xf32> to vector<128x128xbf16>
    %cst_38 = arith.constant dense<0.000000e+00> : vector<128x128xf32>
    %50 = tpu.matmul %48, %49, %cst_38 {dimension_numbers = #tpu.dot_dimension_numbers<[1], [0], [0], [1], [0, 0, 1, 1], [], []>} : vector<128x128xbf16>, vector<128x128xbf16>, vector<128x128xf32> -> vector<128x128xf32>
    %c0_39 = arith.constant 0 : index
    %c0_40 = arith.constant 0 : index
    %51 = vector.load %arg15[%c0_39, %c0_40] : memref<128x1xf32, #tpu.memory_space<vmem>>, vector<128x1xf32>
    %52 = vector.broadcast %51 : vector<128x1xf32> to vector<128x128xf32>
    %53 = arith.addf %50, %52 : vector<128x128xf32>
    %cst_41 = arith.constant 0.000000e+00 : f32
    %54 = vector.broadcast %cst_41 : f32 to vector<128x128xf32>
    %55 = arith.maximumf %53, %54 : vector<128x128xf32>
    %c0_42 = arith.constant 0 : index
    %c0_43 = arith.constant 0 : index
    %56 = vector.load %arg16[%c0_42, %c0_43] : memref<128x128xbf16, #tpu.memory_space<vmem>>, vector<128x128xbf16>
    %57 = arith.truncf %55 : vector<128x128xf32> to vector<128x128xbf16>
    %cst_44 = arith.constant dense<0.000000e+00> : vector<128x128xf32>
    %58 = tpu.matmul %56, %57, %cst_44 {dimension_numbers = #tpu.dot_dimension_numbers<[1], [0], [0], [1], [0, 0, 1, 1], [], []>} : vector<128x128xbf16>, vector<128x128xbf16>, vector<128x128xf32> -> vector<128x128xf32>
    %c0_45 = arith.constant 0 : index
    %c0_46 = arith.constant 0 : index
    %59 = vector.load %arg17[%c0_45, %c0_46] : memref<128x1xf32, #tpu.memory_space<vmem>>, vector<128x1xf32>
    %60 = vector.broadcast %59 : vector<128x1xf32> to vector<128x128xf32>
    %61 = arith.addf %58, %60 : vector<128x128xf32>
    %cst_47 = arith.constant 0.000000e+00 : f32
    %62 = vector.broadcast %cst_47 : f32 to vector<128x128xf32>
    %63 = arith.maximumf %61, %62 : vector<128x128xf32>
    %c0_48 = arith.constant 0 : index
    %c0_49 = arith.constant 0 : index
    %64 = vector.load %arg18[%c0_48, %c0_49] : memref<64x128xbf16, #tpu.memory_space<vmem>>, vector<64x128xbf16>
    %65 = arith.truncf %63 : vector<128x128xf32> to vector<128x128xbf16>
    %cst_50 = arith.constant dense<0.000000e+00> : vector<64x128xf32>
    %66 = tpu.matmul %64, %65, %cst_50 {dimension_numbers = #tpu.dot_dimension_numbers<[1], [0], [0], [1], [0, 0, 1, 1], [], []>} : vector<64x128xbf16>, vector<128x128xbf16>, vector<64x128xf32> -> vector<64x128xf32>
    %c0_51 = arith.constant 0 : index
    %c0_52 = arith.constant 0 : index
    %67 = vector.load %arg19[%c0_51, %c0_52] : memref<64x1xf32, #tpu.memory_space<vmem>>, vector<64x1xf32>
    %68 = vector.broadcast %67 : vector<64x1xf32> to vector<64x128xf32>
    %69 = arith.addf %66, %68 : vector<64x128xf32>
    %cst_53 = arith.constant 0.000000e+00 : f32
    %70 = vector.broadcast %cst_53 : f32 to vector<64x128xf32>
    %71 = arith.maximumf %69, %70 : vector<64x128xf32>
    %c0_54 = arith.constant 0 : index
    %c0_55 = arith.constant 0 : index
    %72 = vector.load %arg20[%c0_54, %c0_55] : memref<8x64xbf16, #tpu.memory_space<vmem>>, vector<8x64xbf16>
    %73 = arith.truncf %71 : vector<64x128xf32> to vector<64x128xbf16>
    %cst_56 = arith.constant dense<0.000000e+00> : vector<8x128xf32>
    %74 = tpu.matmul %72, %73, %cst_56 {dimension_numbers = #tpu.dot_dimension_numbers<[1], [0], [0], [1], [0, 0, 1, 1], [], []>} : vector<8x64xbf16>, vector<64x128xbf16>, vector<8x128xf32> -> vector<8x128xf32>
    %c0_57 = arith.constant 0 : index
    %c0_58 = arith.constant 0 : index
    %75 = vector.load %arg21[%c0_57, %c0_58] : memref<8x1xf32, #tpu.memory_space<vmem>>, vector<8x1xf32>
    %76 = vector.broadcast %75 : vector<8x1xf32> to vector<8x128xf32>
    %77 = arith.addf %74, %76 : vector<8x128xf32>
    %c0_59 = arith.constant 0 : index
    %c0_60 = arith.constant 0 : index
    %78 = vector.load %arg22[%c0_59, %c0_60] : memref<8x128xf32, #tpu.memory_space<vmem>>, vector<8x128xf32>
    tpu.vector_store %arg22[%c0_59, %c0_60], %77 {strides = array<i32>} : memref<8x128xf32, #tpu.memory_space<vmem>>, vector<8x128xf32>,
    return
  }
  func.func @transform_0(%arg0: i32) -> (i32, i32) {
    %c0_i32 = arith.constant 0 : i32
    %c0_i32_0 = arith.constant 0 : i32
    return %c0_i32, %arg0 : i32, i32
  }
  func.func @transform_1(%arg0: i32) -> (i32, i32) {
    %c0_i32 = arith.constant 0 : i32
    %c0_i32_0 = arith.constant 0 : i32
    %c0_i32_1 = arith.constant 0 : i32
    return %c0_i32, %c0_i32_0 : i32, i32
  }
  func.func @transform_2(%arg0: i32) -> (i32, i32) {
    %c0_i32 = arith.constant 0 : i32
    %c0_i32_0 = arith.constant 0 : i32
    %c0_i32_1 = arith.constant 0 : i32
    return %c0_i32, %c0_i32_0 : i32, i32
  }
  func.func @transform_3(%arg0: i32) -> (i32, i32) {
    %c0_i32 = arith.constant 0 : i32
    %c0_i32_0 = arith.constant 0 : i32
    %c0_i32_1 = arith.constant 0 : i32
    return %c0_i32, %c0_i32_0 : i32, i32
  }
  func.func @transform_4(%arg0: i32) -> (i32, i32) {
    %c0_i32 = arith.constant 0 : i32
    %c0_i32_0 = arith.constant 0 : i32
    %c0_i32_1 = arith.constant 0 : i32
    return %c0_i32, %c0_i32_0 : i32, i32
  }
  func.func @transform_5(%arg0: i32) -> (i32, i32) {
    %c0_i32 = arith.constant 0 : i32
    %c0_i32_0 = arith.constant 0 : i32
    %c0_i32_1 = arith.constant 0 : i32
    return %c0_i32, %c0_i32_0 : i32, i32
  }
  func.func @transform_6(%arg0: i32) -> (i32, i32) {
    %c0_i32 = arith.constant 0 : i32
    %c0_i32_0 = arith.constant 0 : i32
    %c0_i32_1 = arith.constant 0 : i32
    return %c0_i32, %c0_i32_0 : i32, i32
  }
  func.func @transform_7(%arg0: i32) -> (i32, i32) {
    %c0_i32 = arith.constant 0 : i32
    %c0_i32_0 = arith.constant 0 : i32
    %c0_i32_1 = arith.constant 0 : i32
    return %c0_i32, %c0_i32_0 : i32, i32
  }
  func.func @transform_8(%arg0: i32) -> (i32, i32) {
    %c0_i32 = arith.constant 0 : i32
    %c0_i32_0 = arith.constant 0 : i32
    %c0_i32_1 = arith.constant 0 : i32
    return %c0_i32, %c0_i32_0 : i32, i32
  }
  func.func @transform_9(%arg0: i32) -> (i32, i32) {
    %c0_i32 = arith.constant 0 : i32
    %c0_i32_0 = arith.constant 0 : i32
    %c0_i32_1 = arith.constant 0 : i32
    return %c0_i32, %c0_i32_0 : i32, i32
  }
  func.func @transform_10(%arg0: i32) -> (i32, i32) {
    %c0_i32 = arith.constant 0 : i32
    %c0_i32_0 = arith.constant 0 : i32
    %c0_i32_1 = arith.constant 0 : i32
    return %c0_i32, %c0_i32_0 : i32, i32
  }
  func.func @transform_11(%arg0: i32) -> (i32, i32) {
    %c0_i32 = arith.constant 0 : i32
    %c0_i32_0 = arith.constant 0 : i32
    %c0_i32_1 = arith.constant 0 : i32
    return %c0_i32, %c0_i32_0 : i32, i32
  }
  func.func @transform_12(%arg0: i32) -> (i32, i32) {
    %c0_i32 = arith.constant 0 : i32
    %c0_i32_0 = arith.constant 0 : i32
    %c0_i32_1 = arith.constant 0 : i32
    return %c0_i32, %c0_i32_0 : i32, i32
  }
  func.func @transform_13(%arg0: i32) -> (i32, i32) {
    %c0_i32 = arith.constant 0 : i32
    %c0_i32_0 = arith.constant 0 : i32
    %c0_i32_1 = arith.constant 0 : i32
    return %c0_i32, %c0_i32_0 : i32, i32
  }
  func.func @transform_14(%arg0: i32) -> (i32, i32) {
    %c0_i32 = arith.constant 0 : i32
    %c0_i32_0 = arith.constant 0 : i32
    %c0_i32_1 = arith.constant 0 : i32
    return %c0_i32, %c0_i32_0 : i32, i32
  }
  func.func @transform_15(%arg0: i32) -> (i32, i32) {
    %c0_i32 = arith.constant 0 : i32
    %c0_i32_0 = arith.constant 0 : i32
    %c0_i32_1 = arith.constant 0 : i32
    return %c0_i32, %c0_i32_0 : i32, i32
  }
  func.func @transform_16(%arg0: i32) -> (i32, i32) {
    %c0_i32 = arith.constant 0 : i32
    %c0_i32_0 = arith.constant 0 : i32
    %c0_i32_1 = arith.constant 0 : i32
    return %c0_i32, %c0_i32_0 : i32, i32
  }
  func.func @transform_17(%arg0: i32) -> (i32, i32) {
    %c0_i32 = arith.constant 0 : i32
    %c0_i32_0 = arith.constant 0 : i32
    %c0_i32_1 = arith.constant 0 : i32
    return %c0_i32, %c0_i32_0 : i32, i32
  }
  func.func @transform_18(%arg0: i32) -> (i32, i32) {
    %c0_i32 = arith.constant 0 : i32
    %c0_i32_0 = arith.constant 0 : i32
    %c0_i32_1 = arith.constant 0 : i32
    return %c0_i32, %c0_i32_0 : i32, i32
  }
  func.func @transform_19(%arg0: i32) -> (i32, i32) {
    %c0_i32 = arith.constant 0 : i32
    %c0_i32_0 = arith.constant 0 : i32
    %c0_i32_1 = arith.constant 0 : i32
    return %c0_i32, %c0_i32_0 : i32, i32
  }
  func.func @transform_20(%arg0: i32) -> (i32, i32) {
    %c0_i32 = arith.constant 0 : i32
    %c0_i32_0 = arith.constant 0 : i32
    %c0_i32_1 = arith.constant 0 : i32
    return %c0_i32, %c0_i32_0 : i32, i32
  }
  func.func @transform_21(%arg0: i32) -> (i32, i32) {
    %c0_i32 = arith.constant 0 : i32
    %c0_i32_0 = arith.constant 0 : i32
    return %c0_i32, %arg0 : i32, i32
  }
}

</mosaic_0001>

<bundles_post_ra>
// kernel: tpu_custom_call.1
= control target key start
LH: loop header
LB: loop body
LE: loop exit
PB: predicated region body
PF: predicated region fallthrough
CT: control target
= control target key end

     0   :  { %s4933_s0 = inlined_call_operand.vmem [shape: bf16[32,256], index: 0, kind: input, shape index: {}]   ;;  %s4934_s1 = inlined_call_operand.vmem [shape: bf16[128,32], index: 1, kind: input, shape index: {}]   ;;  %s4935_s2 = inlined_call_operand.vmem [shape: f32[128,1], index: 2, kind: input, shape index: {}]   ;;  %s4936_s3 = inlined_call_operand.vmem [shape: bf16[128,128], index: 3, kind: input, shape index: {}]   ;;  %s4937_s4 = inlined_call_operand.vmem [shape: f32[128,1], index: 4, kind: input, shape index: {}]   ;;  %s4938_s5 = inlined_call_operand.vmem [shape: bf16[128,128], index: 5, kind: input, shape index: {}]   ;;  %s4939_s6 = inlined_call_operand.vmem [shape: f32[128,1], index: 6, kind: input, shape index: {}]   ;;  %s4940_s7 = inlined_call_operand.vmem [shape: bf16[128,128], index: 7, kind: input, shape index: {}]   ;;  %s4941_s8 = inlined_call_operand.vmem [shape: f32[128,1], index: 8, kind: input, shape index: {}]   ;;  %s4942_s9 = inlined_call_operand.vmem [shape: bf16[128,128], index: 9, kind: input, shape index: {}]   ;;  %s4943_s10 = inlined_call_operand.vmem [shape: f32[128,1], index: 10, kind: input, shape index: {}]   ;;  %s4944_s11 = inlined_call_operand.vmem [shape: bf16[128,128], index: 11, kind: input, shape index: {}]   ;;  %s4945_s12 = inlined_call_operand.vmem [shape: f32[128,1], index: 12, kind: input, shape index: {}]   ;;  %s4946_s13 = inlined_call_operand.vmem [shape: bf16[128,128], index: 13, kind: input, shape index: {}]   ;;  %s4947_s14 = inlined_call_operand.vmem [shape: f32[128,1], index: 14, kind: input, shape index: {}]   ;;  %s4948_s15 = inlined_call_operand.vmem [shape: bf16[128,128], index: 15, kind: input, shape index: {}]   ;;  %s4949_s16 = inlined_call_operand.vmem [shape: f32[128,1], index: 16, kind: input, shape index: {}]   ;;  %s4950_s17 = inlined_call_operand.vmem [shape: bf16[64,128], index: 17, kind: input, shape index: {}]   ;;  %s4951_s18 = inlined_call_operand.vmem [shape: f32[64,1], index: 18, kind: input, shape index: {}]   ;;  %s4952_s19 = inlined_call_operand.vmem [shape: bf16[8,64], index: 19, kind: input, shape index: {}]   ;;  %s4953_s20 = inlined_call_operand.vmem [shape: f32[8,1], index: 20, kind: input, shape index: {}]   ;;  %s4954_s21 = inlined_call_operand.hbm [shape: f32[8,256], index: 21, kind: output, shape index: {}]  }
   0x1   :  { %4973 = sst [smem:[#allocation13_spill]] %s4933_s0 }
   0x2   :  { %4974 = sst [smem:[#allocation14_spill]] %s4934_s1 }
   0x3   :  { %4975 = sst [smem:[#allocation15_spill]] %s4935_s2 }
   0x4   :  { %4976 = sst [smem:[#allocation16_spill]] %s4936_s3 }
   0x5   :  { %4977 = sst [smem:[#allocation17_spill]] %s4937_s4 }
   0x6   :  { %4978 = sst [smem:[#allocation18_spill]] %s4938_s5 }
   0x7   :  { %4979 = sst [smem:[#allocation19_spill]] %s4954_s21 }
   0x8   :  { %26 = vsyncpa [#allocation4], 0 }
   0x9   :  { %28 = vsyncpa [#allocation4 + $0x1], 0  ;;  %s4080_s2 = smov 0   ;;  %s4082_s25 = smov 0  }
   0xa   :  { %s4084_s26 = smov 0   ;;  %s4086_s27 = smov 0  }
   0xb LB: > { %4980 = sst [smem:[#allocation6_spill]] %s3952_s2  ;;  %s4960_s3 = sadd.s32 4294967295, %s3964_s27   ;;  %s3964_s27 = sphi %s4086_s27, %s5002_s27   ;;  %s3960_s26 = sphi %s4084_s26, %s5005_s26   ;;  %s3956_s25 = sphi %s4082_s25, %s5004_s25   ;;  %s3952_s2 = sphi %s4080_s2, %s5003_s2  }
   0xc   : > { %4981 = sst [smem:[#allocation7_spill]] %s3956_s25  ;;  %s3278_s28 = sadd.s32 4294967294, %s3964_s27  }
   0xd   : > { %4982 = sst [smem:[#allocation8_spill]] %s3960_s26  ;;  %s4103_s29 = sadd.s32 1, %s3964_s27  }
   0xe   : > { %4983 = sst [smem:[#allocation9_spill]] %s4103_s29  ;;  %s41_s0 = sadd.s32 1, %s3960_s26 }
   0xf   : > { %s38_s4 = ssub.s32 %s3964_s27, %s4103_s29  ;;  %p48_p0 = scmp.ne.s32.totalorder %s3960_s26, %s3956_s25 }
  0x10   : > { %p39_p1 = scmp.eq.s32.totalorder %s38_s4, 0  ;;  %p49_p2 = scmp.eq.s32.totalorder %s3964_s27, 0 }
  0x11   : > { %p498_p3 = scmp.eq.s32.totalorder %s4960_s3, 1  ;;  %p503_p4 = scmp.ne.s32.totalorder %s3956_s25, %s3952_s2 }
  0x12   : > { %s4116_s30 = scalar_select %p39_p1, %s3960_s26, %s41_s0  }
  0x13   : > { %p50_p5 = por %p49_p2, %p48_p0  ;;  %p4118_p6 = por %p498_p3, %p48_p0 }
  0x14   : > { %4984 = sst [smem:[#allocation10_spill]] %s4116_s30  ;;  %p504_p7 = scmp.eq.s32.totalorder %s3278_s28, 1 }
  0x15   : > { %s4985_s5 = scalar_select %p4118_p6, 1, 0 }
  0x16   : > { %p4122_p8 = por %p504_p7, %p503_p4  ;;  %p3280_p9 = scmp.ge.s32.totalorder %s3964_s27, 2 }
  0x17   : > { %4986 = sst [smem:[#allocation11_spill]] %s4985_s5 }
  0x18   : > { %s4987_s22 = scalar_select %p4122_p8, 1, 0 }
  0x19   : > { %580 = sbr.rel (%p3280_p9) target bundleno = 44 (0x2c), region = 96 }
  0x1a   : > { %4988 = sst [smem:[#allocation12_spill]] %s4987_s22 }
  0x20   : > { %583 = sbr.rel (!%p50_p5) target bundleno = 44 (0x2c), region = 100  ;;  %s585_s23 = sand.u32 (%p50_p5), 1, %s3960_s26  }
  0x21   : > { %s3282_s1 = sshll.u32 (%p50_p5), %s3964_s27, 2  ;;  %s3281_s24 = sshll.u32 (%p50_p5), %s585_s23, 4 }
  0x22   : > { %s4989_s3 = sld [smem:[#allocation13_spill]] (%p50_p5)  ;;  %s587_s28 = scalar_lea.vmem (%p50_p5), [#allocation2], %s3281_s24 }
  0x28   : > { %s589_s30 = scalar_lea.vmem %s4989_s3, %s3282_s1 }
  0x29   : > { %v605_v0 = vld [vmem:[%s589_s30] sm:$0xf]  ;;  %v607_v1 = vld [vmem:[%s589_s30 + $0x8] sm:$0xf]  ;;  %v609_v2 = vld [vmem:[%s589_s30 + $0x10] sm:$0xf] }
  0x2a   : > { %606 = vst [vmem:[%s587_s28] sm:$0xf] %v605_v0  ;;  %608 = vst [vmem:[%s587_s28 + $0x4] sm:$0xf] %v607_v1  ;;  %v611_v3 = vld [vmem:[%s589_s30 + $0x18] sm:$0xf] }
  0x2b   : > { %610 = vst [vmem:[%s587_s28 + $0x8] sm:$0xf] %v609_v2  ;;  %612 = vst [vmem:[%s587_s28 + $0xc] sm:$0xf] %v611_v3 }
  0x2c PF: > { %p3283_p10 = scmp.ge.s32.totalorder %s3964_s27, 1  ;;  %p642_p11 = scmp.lt.s32.totalorder %s3964_s27, 3 }
  0x2e   : > { %p643_p12 = pnand %p3283_p10, %p642_p11 }
  0x2f   : > { %s4990_s3 = sld [smem:[#allocation15_spill]] (!%p643_p12)  ;;  %s4143_s30 = sand.u32 (!%p643_p12), 1, %s3956_s25   ;;  %v3966_v6 = vmov (!%p643_p12), 0   ;;  %vm877_vm0 = vcmask (!%p643_p12), 261120   ;;  %v1321_v47 = vld [vmem:[%s4939_s6 + $0x8] sm:$0xff] (!%p643_p12)  ;;  %v1320_v48 = vld [vmem:[%s4939_s6] sm:$0xff] (!%p643_p12) }
  0x30   : > { %646 = sbr.rel (%p643_p12) target bundleno = 2547 (0x9f3), region = 141  ;;  %3831 = vset.pattern.permute.xlu1 (!%p643_p12), %v3966_v6  ;;  %3830 = vset.pattern.permute.xlu0 (!%p643_p12), %v3966_v6  ;;  %s3284_s23 = sshll.u32 (!%p643_p12), %s4143_s30, 4  ;;  %v1323_v49 = vld [vmem:[%s4939_s6 + $0x18] sm:$0xff] (!%p643_p12)  ;;  %v1322_v50 = vld [vmem:[%s4939_s6 + $0x10] sm:$0xff] (!%p643_p12)  ;;  %v1325_v51 = vld [vmem:[%s4939_s6 + $0x28] sm:$0xff] (!%p643_p12)  ;;  %vm3968_vm1 = vmmov (!%p643_p12), 0  }
  0x31   : > { %s4991_s24 = sld [smem:[#allocation14_spill]] (!%p643_p12)  ;;  %s651_s25 = scalar_lea.vmem (!%p643_p12), [#allocation2], %s3284_s23  ;;  %v1324_v52 = vld [vmem:[%s4939_s6 + $0x20] sm:$0xff] (!%p643_p12)  ;;  %v1327_v53 = vld [vmem:[%s4939_s6 + $0x38] sm:$0xff] (!%p643_p12)  ;;  %v1326_v54 = vld [vmem:[%s4939_s6 + $0x30] sm:$0xff] (!%p643_p12)  ;;  %vm3154_vm2 = vcmask (!%p643_p12), 523264  }
  0x32   : > { %v3832_v10 = vld [vmem:[%s651_s25] sm:$0xff] (!%p643_p12)   ;;  %v3833_v11 = vld [vmem:[%s651_s25 + $0x8] sm:$0xff] (!%p643_p12)   ;;  %s4992_s2 = sld [smem:[#allocation17_spill]] (!%p643_p12)  ;;  %s4994_s5 = sld [smem:[#allocation16_spill]] (!%p643_p12) }
  0x33   : > { %3508 = vmatprep.subr.bf16.mxu0 (!%p643_p12), %v3832_v10  ;;  %v1329_v55 = vld [vmem:[%s4939_s6 + $0x48] sm:$0xff] (!%p643_p12)  ;;  %v1328_v56 = vld [vmem:[%s4939_s6 + $0x40] sm:$0xff] (!%p643_p12)  ;;  %v1331_v57 = vld [vmem:[%s4939_s6 + $0x58] sm:$0xff] (!%p643_p12)  ;;  %s3285_s0 = sshll.u32 (!%p643_p12), %s4143_s30, 3  ;;  %s4997_s22 = sadd.s32 (!%p643_p12), 4294967295, %s3964_s27  }
  0x34   : > { %3509 = vmatpush3.bf16.msra.mxu0 (!%p643_p12), %v3832_v10  ;;  %v1330_v58 = vld [vmem:[%s4939_s6 + $0x50] sm:$0xff] (!%p643_p12)  ;;  %v1333_v59 = vld [vmem:[%s4939_s6 + $0x68] sm:$0xff] (!%p643_p12)  ;;  %v1332_v60 = vld [vmem:[%s4939_s6 + $0x60] sm:$0xff] (!%p643_p12)  ;;  %s3366_s25 = sshll.u32 (!%p643_p12), %s4997_s22, 7  ;;  %s707_s21 = scalar_lea.vmem (!%p643_p12), [#allocation3], %s3285_s0 }
  0x35   : > { %v731_v4 = vld [vmem:[%s4990_s3 + $0x10] sm:$0xff] (!%p643_p12)  ;;  %v729_v5 = vld [vmem:[%s4990_s3] sm:$0xff] (!%p643_p12)  ;;  %v732_v7 = vld [vmem:[%s4990_s3 + $0x18] sm:$0xff] (!%p643_p12)  ;;  %3510 = vmatprep.subr.bf16.mxu0 (!%p643_p12), %v3833_v11  ;;  %s3200_s29 = scalar_lea.sflag (!%p643_p12), [#allocation4], %s4143_s30  ;;  %s3969_s0 = smov (!%p643_p12), [#allocation3]  }
  0x36   : > { %v730_v8 = vld [vmem:[%s4990_s3 + $0x8] sm:$0xff] (!%p643_p12)  ;;  %757 = vperm.xlu1 (!%p643_p12), %3831, %v731_v4   ;;  %747 = vperm.xlu0 (!%p643_p12), %3830, %v729_v5   ;;  %v733_v13 = vld [vmem:[%s4990_s3 + $0x20] sm:$0xff] (!%p643_p12)  ;;  %v736_v14 = vld [vmem:[%s4990_s3 + $0x38] sm:$0xff] (!%p643_p12)  ;;  %s3906_s22 = sshll.u32 (!%p643_p12), %s3969_s0, 4  ;;  %s3907_s22 = int_to_ptr.vmem [resolvable:$false] %s3906_s22 }
  0x37   : > { %v3834_v9 = vld [vmem:[%s4991_s24] sm:$0xff]   ;;  %v734_v12 = vld [vmem:[%s4990_s3 + $0x28] sm:$0xff]  ;;  %v735_v15 = vld [vmem:[%s4990_s3 + $0x30] sm:$0xff]  ;;  %s3908_s28 = scalar_lea.vmem %s3907_s22, 256 }
  0x38   : > { %3512 = vmatprep.mubr.msk.bf16.mxu0 %vm877_vm0, %v3834_v9  ;;  %3511 = vmatpush3.bf16.msra.mxu0 %v3833_v11  ;;  %v3835_v16 = vld [vmem:[%s4991_s24 + $0x8] sm:$0xff]   ;;  %v3836_v17 = vld [vmem:[%s4991_s24 + $0x10] sm:$0xff]   ;;  %v737_v19 = vld [vmem:[%s4990_s3 + $0x40] sm:$0xff]  ;;  %s4993_s1 = smov %s4992_s2 }
  0x39   : > { %v738_v18 = vld [vmem:[%s4990_s3 + $0x48] sm:$0xff]  ;;  %v740_v20 = vld [vmem:[%s4990_s3 + $0x58] sm:$0xff]  ;;  %v739_v21 = vld [vmem:[%s4990_s3 + $0x50] sm:$0xff] }
  0x3a   : > { %762 = vperm.xlu1 %3831, %v732_v7   ;;  %752 = vperm.xlu0 %3830, %v730_v8   ;;  %v3837_v22 = vld [vmem:[%s4991_s24 + $0x18] sm:$0xff]   ;;  %v3838_v23 = vld [vmem:[%s4991_s24 + $0x20] sm:$0xff]   ;;  %v742_v24 = vld [vmem:[%s4990_s3 + $0x68] sm:$0xff] }
  0x3b   : > { %3513 = vmatmul.mubr.msk.bf16.vlgmr.msra.gmra.mrb[0].mxu0 %vm877_vm0, %v3835_v16  ;;  %v741_v25 = vld [vmem:[%s4990_s3 + $0x60] sm:$0xff]  ;;  %v744_v26 = vld [vmem:[%s4990_s3 + $0x78] sm:$0xff]  ;;  %v743_v27 = vld [vmem:[%s4990_s3 + $0x70] sm:$0xff]  ;;  %s4999_s3 = sld [smem:[#allocation19_spill]] }
  0x3c   : > { %3516 = vmatprep.mubr.msk.bf16.mxu0 %vm877_vm0, %v3836_v17  ;;  %v3839_v28 = vld [vmem:[%s4991_s24 + $0x28] sm:$0xff]   ;;  %v3840_v29 = vld [vmem:[%s4991_s24 + $0x30] sm:$0xff]   ;;  %v1039_v31 = vld [vmem:[%s4993_s1] sm:$0xff] }
  0x3d   : > { %v1040_v30 = vld [vmem:[%s4992_s2 + $0x8] sm:$0xff]  ;;  %v1042_v32 = vld [vmem:[%s4993_s1 + $0x18] sm:$0xff]  ;;  %v1041_v33 = vld [vmem:[%s4993_s1 + $0x10] sm:$0xff]  ;;  %s4995_s2 = sld [smem:[#allocation18_spill]] }
  0x3e   : > { %772 = vperm.xlu1 %3831, %v734_v12   ;;  %767 = vperm.xlu0 %3830, %v733_v13   ;;  %v3841_v34 = vld [vmem:[%s4991_s24 + $0x38] sm:$0xff]   ;;  %v1044_v35 = vld [vmem:[%s4993_s1 + $0x28] sm:$0xff]  ;;  %v1043_v36 = vld [vmem:[%s4993_s1 + $0x20] sm:$0xff] }
  0x3f   : > { %v1046_v37 = vld [vmem:[%s4993_s1 + $0x38] sm:$0xff]  ;;  %v1045_v38 = vld [vmem:[%s4993_s1 + $0x30] sm:$0xff]  ;;  %v1048_v39 = vld [vmem:[%s4993_s1 + $0x48] sm:$0xff] }
  0x40   : > { %v1047_v40 = vld [vmem:[%s4993_s1 + $0x40] sm:$0xff]  ;;  %v1050_v41 = vld [vmem:[%s4993_s1 + $0x58] sm:$0xff]  ;;  %v1049_v42 = vld [vmem:[%s4993_s1 + $0x50] sm:$0xff] }
  0x41   : > { %v1052_v43 = vld [vmem:[%s4993_s1 + $0x68] sm:$0xff]  ;;  %v1051_v44 = vld [vmem:[%s4993_s1 + $0x60] sm:$0xff]  ;;  %v1054_v45 = vld [vmem:[%s4993_s1 + $0x78] sm:$0xff] }
  0x42   : > { %782 = vperm.xlu1 %3831, %v736_v14   ;;  %777 = vperm.xlu0 %3830, %v735_v15   ;;  %v1053_v46 = vld [vmem:[%s4993_s1 + $0x70] sm:$0xff]  ;;  %v1335_v61 = vld [vmem:[%s4939_s6 + $0x78] sm:$0xff]  ;;  %v1602_v63 = vld [vmem:[%s4941_s8 + $0x8] sm:$0xff] }
  0x43   : > { %3517 = vmatmul.mubr.msk.bf16.gmra.mrb[4].mxu0 %vm877_vm0, %v3837_v22  ;;  %v1334_v62 = vld [vmem:[%s4939_s6 + $0x70] sm:$0xff]  ;;  %v1601_v0 = vld [vmem:[%s4941_s8] sm:$0xff]  ;;  %v1604_v1 = vld [vmem:[%s4941_s8 + $0x18] sm:$0xff]  ;;  %s4996_s4 = smov %s4995_s2 }
  0x44   : > { %3520 = vmatprep.mubr.msk.bf16.mxu0 %vm877_vm0, %v3838_v23  ;;  %v1603_v2 = vld [vmem:[%s4941_s8 + $0x10] sm:$0xff]  ;;  %v1606_v3 = vld [vmem:[%s4941_s8 + $0x28] sm:$0xff]  ;;  %v1605_v4 = vld [vmem:[%s4941_s8 + $0x20] sm:$0xff] }
  0x45   : > { %v1608_v5 = vld [vmem:[%s4941_s8 + $0x38] sm:$0xff]  ;;  %v1607_v6 = vld [vmem:[%s4941_s8 + $0x30] sm:$0xff]  ;;  %v1610_v7 = vld [vmem:[%s4941_s8 + $0x48] sm:$0xff] }
  0x46   : > { %792 = vperm.xlu1 %3831, %v738_v18   ;;  %787 = vperm.xlu0 %3830, %v737_v19   ;;  %v1609_v8 = vld [vmem:[%s4941_s8 + $0x40] sm:$0xff]  ;;  %v1612_v9 = vld [vmem:[%s4941_s8 + $0x58] sm:$0xff]  ;;  %v1611_v10 = vld [vmem:[%s4941_s8 + $0x50] sm:$0xff] }
  0x47   : > { %v1614_v11 = vld [vmem:[%s4941_s8 + $0x68] sm:$0xff]  ;;  %v1613_v12 = vld [vmem:[%s4941_s8 + $0x60] sm:$0xff]  ;;  %v1616_v13 = vld [vmem:[%s4941_s8 + $0x78] sm:$0xff] }
  0x48   : > { %v1615_v14 = vld [vmem:[%s4941_s8 + $0x70] sm:$0xff]  ;;  %v1883_v15 = vld [vmem:[%s4943_s10 + $0x8] sm:$0xff]  ;;  %v1882_v16 = vld [vmem:[%s4943_s10] sm:$0xff] }
  0x49   : > { %v1885_v17 = vld [vmem:[%s4943_s10 + $0x18] sm:$0xff]  ;;  %v1884_v18 = vld [vmem:[%s4943_s10 + $0x10] sm:$0xff]  ;;  %v1887_v19 = vld [vmem:[%s4943_s10 + $0x28] sm:$0xff] }
  0x4a   : > { %802 = vperm.xlu1 %3831, %v740_v20   ;;  %797 = vperm.xlu0 %3830, %v739_v21   ;;  %v1886_v20 = vld [vmem:[%s4943_s10 + $0x20] sm:$0xff]  ;;  %v1889_v22 = vld [vmem:[%s4943_s10 + $0x38] sm:$0xff]  ;;  %v1888_v23 = vld [vmem:[%s4943_s10 + $0x30] sm:$0xff] }
  0x4b   : > { %3521 = vmatmul.mubr.msk.bf16.gmra.mrb[8].mxu0 %vm877_vm0, %v3839_v28  ;;  %v3842_v21 = vld [vmem:[%s4994_s5] sm:$0xff]   ;;  %v1895_v28 = vld [vmem:[%s4943_s10 + $0x68] sm:$0xff] }
  0x4c   : > { %3524 = vmatprep.mubr.msk.bf16.mxu0 %vm877_vm0, %v3840_v29  ;;  %3544 = vmatprep.mubr.bf16.mxu1 %v3842_v21  ;;  %v1894_v29 = vld [vmem:[%s4943_s10 + $0x60] sm:$0xff] }
  0x4e   : > { %812 = vperm.xlu1 %3831, %v742_v24   ;;  %807 = vperm.xlu0 %3830, %v741_v25   ;;  %v1891_v24 = vld [vmem:[%s4943_s10 + $0x48] sm:$0xff]  ;;  %v1890_v25 = vld [vmem:[%s4943_s10 + $0x40] sm:$0xff] }
  0x52   : > { %822 = vperm.xlu1 %3831, %v744_v26   ;;  %817 = vperm.xlu0 %3830, %v743_v27   ;;  %v1893_v26 = vld [vmem:[%s4943_s10 + $0x58] sm:$0xff]  ;;  %v1892_v27 = vld [vmem:[%s4943_s10 + $0x50] sm:$0xff] }
  0x53   : > { %3525 = vmatmul.mubr.msk.bf16.gmra.mrb[12].mxu0 %vm877_vm0, %v3841_v34 }
  0x56   : > { %1062 = vperm.xlu1 %3831, %v1040_v30   ;;  %1057 = vperm.xlu0 %3830, %v1039_v31   ;;  %v1897_v30 = vld [vmem:[%s4943_s10 + $0x78] sm:$0xff]  ;;  %v1896_v31 = vld [vmem:[%s4943_s10 + $0x70] sm:$0xff] }
  0x5a   : > { %1072 = vperm.xlu1 %3831, %v1042_v32   ;;  %1067 = vperm.xlu0 %3830, %v1041_v33   ;;  %v2164_v32 = vld [vmem:[%s4945_s12 + $0x8] sm:$0xff]  ;;  %v2163_v33 = vld [vmem:[%s4945_s12] sm:$0xff] }
  0x5e   : > { %1082 = vperm.xlu1 %3831, %v1044_v35   ;;  %1077 = vperm.xlu0 %3830, %v1043_v36   ;;  %v2166_v36 = vld [vmem:[%s4945_s12 + $0x18] sm:$0xff] }
  0x62   : > { %1092 = vperm.xlu1 %3831, %v1046_v37   ;;  %1087 = vperm.xlu0 %3830, %v1045_v38   ;;  %v2165_v37 = vld [vmem:[%s4945_s12 + $0x10] sm:$0xff] }
  0x66   : > { %1102 = vperm.xlu1 %3831, %v1048_v39   ;;  %1097 = vperm.xlu0 %3830, %v1047_v40   ;;  %v2168_v39 = vld [vmem:[%s4945_s12 + $0x28] sm:$0xff]  ;;  %v2167_v40 = vld [vmem:[%s4945_s12 + $0x20] sm:$0xff] }
  0x6a   : > { %1112 = vperm.xlu1 %3831, %v1050_v41   ;;  %1107 = vperm.xlu0 %3830, %v1049_v42   ;;  %v2170_v42 = vld [vmem:[%s4945_s12 + $0x38] sm:$0xff] }
  0x6e   : > { %1122 = vperm.xlu1 %3831, %v1052_v43   ;;  %1117 = vperm.xlu0 %3830, %v1051_v44   ;;  %v2169_v43 = vld [vmem:[%s4945_s12 + $0x30] sm:$0xff] }
  0x72   : > { %1132 = vperm.xlu1 %3831, %v1054_v45   ;;  %1127 = vperm.xlu0 %3830, %v1053_v46   ;;  %v2172_v46 = vld [vmem:[%s4945_s12 + $0x48] sm:$0xff] }
  0x76   : > { %1343 = vperm.xlu1 %3831, %v1321_v47   ;;  %1338 = vperm.xlu0 %3830, %v1320_v48   ;;  %v2171_v47 = vld [vmem:[%s4945_s12 + $0x40] sm:$0xff] }
  0x7a   : > { %1353 = vperm.xlu1 %3831, %v1323_v49   ;;  %1348 = vperm.xlu0 %3830, %v1322_v50   ;;  %v2174_v49 = vld [vmem:[%s4945_s12 + $0x58] sm:$0xff]  ;;  %v2173_v50 = vld [vmem:[%s4945_s12 + $0x50] sm:$0xff] }
  0x7e   : > { %1363 = vperm.xlu1 %3831, %v1325_v51   ;;  %1358 = vperm.xlu0 %3830, %v1324_v52   ;;  %v2176_v52 = vld [vmem:[%s4945_s12 + $0x68] sm:$0xff] }
  0x82   : > { %1373 = vperm.xlu1 %3831, %v1327_v53   ;;  %1368 = vperm.xlu0 %3830, %v1326_v54   ;;  %v2175_v53 = vld [vmem:[%s4945_s12 + $0x60] sm:$0xff] }
  0x86   : > { %1383 = vperm.xlu1 %3831, %v1329_v55   ;;  %1378 = vperm.xlu0 %3830, %v1328_v56   ;;  %v2178_v56 = vld [vmem:[%s4945_s12 + $0x78] sm:$0xff] }
  0x8a   : > { %1393 = vperm.xlu1 %3831, %v1331_v57   ;;  %1388 = vperm.xlu0 %3830, %v1330_v58   ;;  %v2177_v57 = vld [vmem:[%s4945_s12 + $0x70] sm:$0xff] }
  0x8e   : > { %1403 = vperm.xlu1 %3831, %v1333_v59   ;;  %1398 = vperm.xlu0 %3830, %v1332_v60   ;;  %v2445_v59 = vld [vmem:[%s4947_s14 + $0x8] sm:$0xff]  ;;  %v2444_v60 = vld [vmem:[%s4947_s14] sm:$0xff] }
  0x92   : > { %1413 = vperm.xlu1 %3831, %v1335_v61   ;;  %1408 = vperm.xlu0 %3830, %v1334_v62   ;;  %v2447_v62 = vld [vmem:[%s4947_s14 + $0x18] sm:$0xff] }
  0x96   : > { %1624 = vperm.xlu1 %3831, %v1602_v63   ;;  %1619 = vperm.xlu0 %3830, %v1601_v0   ;;  %v2446_v63 = vld [vmem:[%s4947_s14 + $0x10] sm:$0xff] }
  0x9a   : > { %1634 = vperm.xlu1 %3831, %v1604_v1   ;;  %1629 = vperm.xlu0 %3830, %v1603_v2   ;;  %v2449_v2 = vld [vmem:[%s4947_s14 + $0x28] sm:$0xff] }
  0x9e   : > { %1644 = vperm.xlu1 %3831, %v1606_v3   ;;  %1639 = vperm.xlu0 %3830, %v1605_v4   ;;  %v2448_v3 = vld [vmem:[%s4947_s14 + $0x20] sm:$0xff] }
  0xa2   : > { %1654 = vperm.xlu1 %3831, %v1608_v5   ;;  %1649 = vperm.xlu0 %3830, %v1607_v6   ;;  %v2451_v5 = vld [vmem:[%s4947_s14 + $0x38] sm:$0xff]  ;;  %v2450_v6 = vld [vmem:[%s4947_s14 + $0x30] sm:$0xff] }
  0xa6   : > { %1664 = vperm.xlu1 %3831, %v1610_v7   ;;  %1659 = vperm.xlu0 %3830, %v1609_v8   ;;  %v2453_v8 = vld [vmem:[%s4947_s14 + $0x48] sm:$0xff] }
  0xaa   : > { %1674 = vperm.xlu1 %3831, %v1612_v9   ;;  %1669 = vperm.xlu0 %3830, %v1611_v10   ;;  %v2452_v9 = vld [vmem:[%s4947_s14 + $0x40] sm:$0xff] }
  0xae   : > { %1684 = vperm.xlu1 %3831, %v1614_v11   ;;  %1679 = vperm.xlu0 %3830, %v1613_v12   ;;  %v2455_v12 = vld [vmem:[%s4947_s14 + $0x58] sm:$0xff] }
  0xb2   : > { %1694 = vperm.xlu1 %3831, %v1616_v13   ;;  %1689 = vperm.xlu0 %3830, %v1615_v14   ;;  %v2454_v13 = vld [vmem:[%s4947_s14 + $0x50] sm:$0xff] }
  0xb5   : > { %v4421_v34 = vpop.permute.xlu0 %747  ;;  %v4423_v35 = vpop.permute.xlu1 %757 }
  0xb6   : > { %1905 = vperm.xlu1 %3831, %v1883_v15   ;;  %1900 = vperm.xlu0 %3830, %v1882_v16   ;;  %v2457_v15 = vld [vmem:[%s4947_s14 + $0x68] sm:$0xff]  ;;  %v2456_v16 = vld [vmem:[%s4947_s14 + $0x60] sm:$0xff] }
  0xb9   : > { %v4431_v38 = vpop.permute.xlu0 %752  ;;  %v4439_v41 = vpop.permute.xlu1 %762 }
  0xba   : > { %1915 = vperm.xlu1 %3831, %v1885_v17   ;;  %1910 = vperm.xlu0 %3830, %v1884_v18   ;;  %v2459_v18 = vld [vmem:[%s4947_s14 + $0x78] sm:$0xff] }
  0xbd   : > { %v4447_v44 = vpop.permute.xlu0 %767  ;;  %v4449_v45 = vpop.permute.xlu1 %772 }
  0xbe   : > { %1925 = vperm.xlu1 %3831, %v1887_v19   ;;  %1920 = vperm.xlu0 %3830, %v1886_v20   ;;  %v2458_v19 = vld [vmem:[%s4947_s14 + $0x70] sm:$0xff] }
  0xc1   : > { %v4457_v48 = vpop.permute.xlu0 %777  ;;  %v4465_v51 = vpop.permute.xlu1 %782 }
  0xc2   : > { %1935 = vperm.xlu1 %3831, %v1889_v22   ;;  %1930 = vperm.xlu0 %3830, %v1888_v23   ;;  %v2726_v22 = vld [vmem:[%s4949_s16 + $0x8] sm:$0xff]  ;;  %v2725_v23 = vld [vmem:[%s4949_s16] sm:$0xff] }
  0xc5   : > { %v4473_v54 = vpop.permute.xlu0 %787  ;;  %v4475_v55 = vpop.permute.xlu1 %792 }
  0xc6   : > { %1945 = vperm.xlu1 %3831, %v1891_v24   ;;  %1940 = vperm.xlu0 %3830, %v1890_v25  }
  0xc9   : > { %v4483_v58 = vpop.permute.xlu0 %797  ;;  %v4491_v61 = vpop.permute.xlu1 %802 }
  0xca   : > { %1955 = vperm.xlu1 %3831, %v1893_v26   ;;  %1950 = vperm.xlu0 %3830, %v1892_v27  }
  0xcd   : > { %v4499_v0 = vpop.permute.xlu0 %807  ;;  %v4501_v1 = vpop.permute.xlu1 %812 }
  0xce   : > { %1965 = vperm.xlu1 %3831, %v1895_v28   ;;  %1960 = vperm.xlu0 %3830, %v1894_v29   ;;  %v2728_v28 = vld [vmem:[%s4949_s16 + $0x18] sm:$0xff]  ;;  %v2727_v29 = vld [vmem:[%s4949_s16 + $0x10] sm:$0xff] }
  0xd1   : > { %v4509_v4 = vpop.permute.xlu0 %817  ;;  %v4517_v7 = vpop.permute.xlu1 %822 }
  0xd2   : > { %1975 = vperm.xlu1 %3831, %v1897_v30   ;;  %1970 = vperm.xlu0 %3830, %v1896_v31  }
  0xd5   : > { %v4525_v10 = vpop.permute.xlu0 %1057  ;;  %v4527_v11 = vpop.permute.xlu1 %1062 }
  0xd6   : > { %2186 = vperm.xlu1 %3831, %v2164_v32   ;;  %2181 = vperm.xlu0 %3830, %v2163_v33  }
  0xd9   : > { %v4535_v14 = vpop.permute.xlu0 %1067  ;;  %v4543_v17 = vpop.permute.xlu1 %1072 }
  0xda   : > { %2196 = vperm.xlu1 %3831, %v2166_v36   ;;  %2191 = vperm.xlu0 %3830, %v2165_v37  }
  0xdd   : > { %v4551_v20 = vpop.permute.xlu0 %1077  ;;  %v4553_v21 = vpop.permute.xlu1 %1082 }
  0xde   : > { %2206 = vperm.xlu1 %3831, %v2168_v39   ;;  %2201 = vperm.xlu0 %3830, %v2167_v40   ;;  %v2730_v40 = vld [vmem:[%s4949_s16 + $0x28] sm:$0xff] }
  0xe1   : > { %v4561_v25 = vpop.permute.xlu0 %1087  ;;  %v4570_v30 = vpop.permute.xlu1 %1092 }
  0xe2   : > { %2216 = vperm.xlu1 %3831, %v2170_v42   ;;  %2211 = vperm.xlu0 %3830, %v2169_v43   ;;  %v2729_v42 = vld [vmem:[%s4949_s16 + $0x20] sm:$0xff] }
  0xe6   : > { %2226 = vperm.xlu1 %3831, %v2172_v46   ;;  %2221 = vperm.xlu0 %3830, %v2171_v47   ;;  %v4581_v46 = vpop.permute.xlu0 %1097  ;;  %v4583_v47 = vpop.permute.xlu1 %1102 }
  0xea   : > { %2236 = vperm.xlu1 %3831, %v2174_v49   ;;  %2231 = vperm.xlu0 %3830, %v2173_v50  }
  0xee   : > { %2246 = vperm.xlu1 %3831, %v2176_v52   ;;  %2241 = vperm.xlu0 %3830, %v2175_v53   ;;  %v2732_v53 = vld [vmem:[%s4949_s16 + $0x38] sm:$0xff] }
  0xf2   : > { %2256 = vperm.xlu1 %3831, %v2178_v56   ;;  %2251 = vperm.xlu0 %3830, %v2177_v57  }
  0xf6   : > { %2467 = vperm.xlu1 %3831, %v2445_v59   ;;  %2462 = vperm.xlu0 %3830, %v2444_v60   ;;  %v2731_v59 = vld [vmem:[%s4949_s16 + $0x30] sm:$0xff] }
  0xfa   : > { %2477 = vperm.xlu1 %3831, %v2447_v62   ;;  %2472 = vperm.xlu0 %3830, %v2446_v63  }
  0xfe   : > { %2487 = vperm.xlu1 %3831, %v2449_v2   ;;  %2482 = vperm.xlu0 %3830, %v2448_v3  }
 0x102   : > { %2497 = vperm.xlu1 %3831, %v2451_v5   ;;  %2492 = vperm.xlu0 %3830, %v2450_v6   ;;  %v4600_v5 = vpop.permute.xlu1 %1112 }
 0x106   : > { %2507 = vperm.xlu1 %3831, %v2453_v8   ;;  %2502 = vperm.xlu0 %3830, %v2452_v9  }
 0x10a   : > { %2517 = vperm.xlu1 %3831, %v2455_v12   ;;  %2512 = vperm.xlu0 %3830, %v2454_v13  }
 0x10e   : > { %2527 = vperm.xlu1 %3831, %v2457_v15   ;;  %2522 = vperm.xlu0 %3830, %v2456_v16   ;;  %v3514_v24 = vpop.f32.mrb[0].mxu0  ;;  %v2736_v16 = vld [vmem:[%s4949_s16 + $0x58] sm:$0xff] }
 0x10f   : > { %v945_v26 = vadd.f32 %v3514_v24, %v4423_v35  ;;  %v936_v27 = vpop.f32.mrb[1].mxu0 }
 0x110   : > { %v937_v31 = vadd.f32 %v936_v27, %v4421_v34  ;;  %v3515_v32 = vpop.f32.mrb[2].mxu0 }
 0x111   : > { %v948_v33 = vadd.f32 %v3515_v32, %v4439_v41  ;;  %v939_v36 = vpop.f32.mrb[3].mxu0  ;;  %v1001_v35 = vmax.f32 %v945_v26, 0.0 }
 0x112   : > { %2537 = vperm.xlu1 %3831, %v2459_v18   ;;  %2532 = vperm.xlu0 %3830, %v2458_v19   ;;  %v940_v37 = vadd.f32 %v939_v36, %v4431_v38  ;;  %v999_v43 = vmax.f32 %v937_v31, 0.0 }
 0x113   : > { %v1002_v39 = vmax.f32 %v948_v33, 0.0 }
 0x114   : > { %v1000_v34 = vmax.f32 %v940_v37, 0.0 }
 0x115   : > { %v1032_v41 = vpack.c.bf16 %v1002_v39, %v1001_v35 }
 0x116   : > { %2748 = vperm.xlu1 %3831, %v2726_v22   ;;  %2743 = vperm.xlu0 %3830, %v2725_v23   ;;  %v3518_v38 = vpop.f32.mrb[4].mxu0  ;;  %v1031_v49 = vpack.c.bf16 %v1000_v34, %v999_v43  ;;  %v2735_v22 = vld [vmem:[%s4949_s16 + $0x50] sm:$0xff] }
 0x117   : > { %v961_v50 = vadd.f32 %v3518_v38, %v4457_v48  ;;  %v952_v52 = vpop.f32.mrb[5].mxu0  ;;  %v4595_v48 = vpop.permute.xlu0 %1107 }
 0x118   : > { %v953_v56 = vadd.f32 %v952_v52, %v4447_v44  ;;  %v3519_v57 = vpop.f32.mrb[6].mxu0  ;;  %3528 = vmatprep.subr.bf16.mxu1 %v1031_v49  ;;  %v2734_v44 = vld [vmem:[%s4949_s16 + $0x48] sm:$0xff] }
 0x119   : > { %v964_v60 = vadd.f32 %v3519_v57, %v4465_v51  ;;  %v955_v62 = vpop.f32.mrb[7].mxu0  ;;  %3529 = vmatpush3.bf16.msra.mxu1 %v1031_v49  ;;  %v1005_v2 = vmax.f32 %v961_v50, 0.0  ;;  %v2733_v51 = vld [vmem:[%s4949_s16 + $0x40] sm:$0xff] }
 0x11a   : > { %2758 = vperm.xlu1 %3831, %v2728_v28   ;;  %2753 = vperm.xlu0 %3830, %v2727_v29   ;;  %v956_v63 = vadd.f32 %v955_v62, %v4449_v45  ;;  %v1003_v6 = vmax.f32 %v953_v56, 0.0  ;;  %v2738_v29 = vld [vmem:[%s4949_s16 + $0x68] sm:$0xff]  ;;  %v2998_v57 = vld [vmem:[%s4951_s18] sm:$0xff]  ;;  %v3001_v62 = vld [vmem:[%s4951_s18 + $0x18] sm:$0xff] }
 0x11b   : > { %3530 = vmatprep.subr.bf16.mxu1 %v1032_v41  ;;  %v1006_v3 = vmax.f32 %v964_v60, 0.0  ;;  %v4613_v23 = vpop.permute.xlu0 %1117 }
 0x11c   : > { %v1004_v8 = vmax.f32 %v956_v63, 0.0  ;;  %v3000_v63 = vld [vmem:[%s4951_s18 + $0x10] sm:$0xff] }
 0x11d   : > { %v1034_v45 = vpack.c.bf16 %v1006_v3, %v1005_v2  ;;  %3531 = vmatpush3.bf16.msra.mxu1 %v1032_v41  ;;  %v2739_v41 = vld [vmem:[%s4949_s16 + $0x70] sm:$0xff]  ;;  %v3003_v3 = vld [vmem:[%s4951_s18 + $0x28] sm:$0xff] }
 0x11e   : > { %2768 = vperm.xlu1 %3831, %v2730_v40   ;;  %2763 = vperm.xlu0 %3830, %v2729_v42   ;;  %v1033_v9 = vpack.c.bf16 %v1004_v8, %v1003_v6  ;;  %v3522_v12 = vpop.f32.mrb[8].mxu0  ;;  %v2740_v40 = vld [vmem:[%s4949_s16 + $0x78] sm:$0xff]  ;;  %v3002_v6 = vld [vmem:[%s4951_s18 + $0x20] sm:$0xff]  ;;  %v3843_v8 = vld [vmem:[%s4994_s5 + $0x8] sm:$0xff]  }
 0x11f   : > { %v977_v13 = vadd.f32 %v3522_v12, %v4483_v58  ;;  %v968_v15 = vpop.f32.mrb[9].mxu0  ;;  %v4616_v58 = vpop.permute.xlu1 %1122 }
 0x120   : > { %v969_v18 = vadd.f32 %v968_v15, %v4473_v54  ;;  %v3523_v19 = vpop.f32.mrb[10].mxu0  ;;  %3532 = vmatprep.subr.bf16.mxu1 %v1033_v9  ;;  %v3148_v15 = vld [vmem:[%s4953_s20] sm:$0xff] }
 0x121   : > { %v980_v24 = vadd.f32 %v3523_v19, %v4491_v61  ;;  %v971_v26 = vpop.f32.mrb[11].mxu0  ;;  %3533 = vmatpush3.bf16.msra.mxu1 %v1033_v9  ;;  %v1009_v28 = vmax.f32 %v977_v13, 0.0  ;;  %v2737_v61 = vld [vmem:[%s4949_s16 + $0x60] sm:$0xff]  ;;  %v3004_v9 = vld [vmem:[%s4951_s18 + $0x30] sm:$0xff] }
 0x122   : > { %2778 = vperm.xlu1 %3831, %v2732_v53   ;;  %2773 = vperm.xlu0 %3830, %v2731_v59   ;;  %v972_v27 = vadd.f32 %v971_v26, %v4475_v55  ;;  %v1007_v31 = vmax.f32 %v969_v18, 0.0  ;;  %v4625_v55 = vpop.permute.xlu0 %1127  ;;  %v3846_v18 = vld [vmem:[%s4994_s5 + $0x20] sm:$0xff]   ;;  %v3849_v26 = vld [vmem:[%s4994_s5 + $0x38] sm:$0xff]  }
 0x123   : > { %3534 = vmatprep.subr.bf16.mxu1 %v1034_v45  ;;  %v1010_v54 = vmax.f32 %v980_v24, 0.0  ;;  %v4631_v42 = vpop.permute.xlu1 %1132  ;;  %v3848_v24 = vld [vmem:[%s4994_s5 + $0x30] sm:$0xff]  }
 0x124   : > { %v1008_v32 = vmax.f32 %v972_v27, 0.0  ;;  %v3850_v27 = vld [vmem:[%s4995_s2] sm:$0xff]   ;;  %s3213_s2 = sshll.u32 %s707_s21, 4  ;;  %s4891_s2 = int_to_ptr.vmem [resolvable:$true] %s3213_s2 }
 0x125   : > { %v1036_v33 = vpack.c.bf16 %v1010_v54, %v1009_v28  ;;  %3535 = vmatpush3.bf16.msra.mxu1 %v1034_v45  ;;  %v3005_v45 = vld [vmem:[%s4951_s18 + $0x38] sm:$0xff]  ;;  %3576 = vmatprep.mubr.bf16.mxu0 %v3850_v27  ;;  %s3902_s23 = scalar_lea.vmem %s4891_s2, 128  ;;  %p3909_p2 = scmp.lt.s32.totalorder %s4891_s2, %s3907_s22 }
 0x126   : > { %2788 = vperm.xlu1 %3831, %v2734_v44   ;;  %2783 = vperm.xlu0 %3830, %v2733_v51   ;;  %v1035_v36 = vpack.c.bf16 %v1008_v32, %v1007_v31  ;;  %v3526_v37 = vpop.f32.mrb[12].mxu0  ;;  %v3844_v51 = vld [vmem:[%s4994_s5 + $0x10] sm:$0xff]   ;;  %p3903_p13 = scmp.ne.s32.totalorder %s4891_s2, %s3902_s23  ;;  %p3910_p3 = scmp.lt.s32.totalorder %s3908_s28, %s3902_s23 }
 0x127   : > { %v993_v35 = vadd.f32 %v3526_v37, %v4509_v4  ;;  %v984_v39 = vpop.f32.mrb[13].mxu0 }
 0x128   : > { %v985_v43 = vadd.f32 %v984_v39, %v4499_v0  ;;  %v3527_v34 = vpop.f32.mrb[14].mxu0  ;;  %3536 = vmatprep.subr.bf16.mxu1 %v1035_v36  ;;  %v2999_v0 = vld [vmem:[%s4951_s18 + $0x8] sm:$0xff]  ;;  %p3904_p0 = pnand %p3903_p13, %p4118_p6  ;;  %p3911_p4 = por %p3910_p3, %p3909_p2 }
 0x129   : > { %v996_v38 = vadd.f32 %v3527_v34, %v4517_v7  ;;  %v987_v49 = vpop.f32.mrb[15].mxu0  ;;  %3537 = vmatpush3.bf16.msra.mxu1 %v1035_v36  ;;  %v1013_v50 = vmax.f32 %v993_v35, 0.0  ;;  %v4645_v7 = vpop.permute.xlu0 %1338 }
 0x12a   : > { %2798 = vperm.xlu1 %3831, %v2736_v16   ;;  %2793 = vperm.xlu0 %3830, %v2735_v22   ;;  %v988_v4 = vadd.f32 %v987_v49, %v4501_v1  ;;  %v1011_v53 = vmax.f32 %v985_v43, 0.0  ;;  %v4647_v1 = vpop.permute.xlu1 %1343  ;;  %v3845_v16 = vld [vmem:[%s4994_s5 + $0x18] sm:$0xff]   ;;  %v3847_v22 = vld [vmem:[%s4994_s5 + $0x28] sm:$0xff]   ;;  %p3905_p1 = pneg %p3904_p0 }
 0x12b   : > { %3538 = vmatprep.subr.bf16.mxu1 %v1036_v33  ;;  %v1014_v52 = vmax.f32 %v996_v38, 0.0 }
 0x12c   : > { %v1012_v56 = vmax.f32 %v988_v4, 0.0  ;;  %p3912_p5 = pnand %p3911_p4, %p3905_p1 }
 0x12d   : > { %v1038_v59 = vpack.c.bf16 %v1014_v52, %v1013_v50  ;;  %3539 = vmatpush3.bf16.msra.mxu1 %v1036_v33  ;;  %v4655_v2 = vpop.permute.xlu0 %1348 }
 0x12e   : > { %2808 = vperm.xlu1 %3831, %v2738_v29   ;;  %2803 = vperm.xlu0 %3830, %v2737_v61   ;;  %v1037_v60 = vpack.c.bf16 %v1012_v56, %v1011_v53  ;;  %v4660_v44 = vpop.permute.xlu1 %1353 }
 0x130   : > { %3540 = vmatprep.subr.bf16.mxu1 %v1037_v60 }
 0x131   : > { %3541 = vmatpush3.bf16.msra.mxu1 %v1037_v60  ;;  %v4677_v12 = vpop.permute.xlu0 %1358 }
 0x132   : > { %2818 = vperm.xlu1 %3831, %v2740_v40   ;;  %2813 = vperm.xlu0 %3830, %v2739_v41   ;;  %v4679_v13 = vpop.permute.xlu1 %1363 }
 0x133   : > { %3542 = vmatprep.subr.bf16.mxu1 %v1038_v59 }
 0x135   : > { %3543 = vmatpush3.bf16.msra.mxu1 %v1038_v59  ;;  %v4690_v19 = vpop.permute.xlu0 %1368 }
 0x136   : > { %3013 = vperm.xlu1 %3831, %v2999_v0   ;;  %3008 = vperm.xlu0 %3830, %v2998_v57  }
 0x138   : > { %3545 = vmatmul.mubr.bf16.vlgmr.msra.gmra.mrb[0].mxu1 %v3843_v8 }
 0x139   : > { %3548 = vmatprep.mubr.bf16.mxu1 %v3844_v51 }
 0x13a   : > { %3023 = vperm.xlu1 %3831, %v3001_v62   ;;  %3018 = vperm.xlu0 %3830, %v3000_v63  }
 0x13e   : > { %3033 = vperm.xlu1 %3831, %v3003_v3   ;;  %3028 = vperm.xlu0 %3830, %v3002_v6  }
 0x140   : > { %3549 = vmatmul.mubr.bf16.gmra.mrb[4].mxu1 %v3845_v16 }
 0x141   : > { %3552 = vmatprep.mubr.bf16.mxu1 %v3846_v18 }
 0x142   : > { %3043 = vperm.xlu1 %3831, %v3005_v45   ;;  %3038 = vperm.xlu0 %3830, %v3004_v9  }
 0x146   : > { %3151 = vperm.xlu0 %3830, %v3148_v15  }
 0x148   : > { %3553 = vmatmul.mubr.bf16.gmra.mrb[8].mxu1 %v3847_v22 }
 0x149   : > { %3556 = vmatprep.mubr.bf16.mxu1 %v3848_v24 }
 0x150   : > { %3557 = vmatmul.mubr.bf16.gmra.mrb[12].mxu1 %v3849_v26 }
 0x20b   : > { %v3546_v28 = vpop.f32.mrb[0].mxu1 }
 0x20c   : > { %v1226_v54 = vadd.f32 %v3546_v28, %v4535_v14  ;;  %v1217_v29 = vpop.f32.mrb[1].mxu1 }
 0x20d   : > { %v1218_v31 = vadd.f32 %v1217_v29, %v4525_v10  ;;  %v3547_v32 = vpop.f32.mrb[2].mxu1 }
 0x20e   : > { %v1229_v61 = vadd.f32 %v3547_v32, %v4543_v17  ;;  %v1220_v33 = vpop.f32.mrb[3].mxu1  ;;  %v1282_v37 = vmax.f32 %v1226_v54, 0.0  ;;  %v3856_v32 = vld [vmem:[%s4996_s4 + $0x30] sm:$0xff]  }
 0x20f   : > { %v1221_v36 = vadd.f32 %v1220_v33, %v4527_v11  ;;  %v1280_v39 = vmax.f32 %v1218_v31, 0.0  ;;  %v3855_v31 = vld [vmem:[%s4996_s4 + $0x28] sm:$0xff]   ;;  %v3858_v33 = vld [vmem:[%s4940_s7] sm:$0xff]  }
 0x210   : > { %v1283_v35 = vmax.f32 %v1229_v61, 0.0  ;;  %v3857_v61 = vld [vmem:[%s4996_s4 + $0x38] sm:$0xff]   ;;  %3608 = vmatprep.mubr.bf16.mxu1 %v3858_v33 }
 0x211   : > { %v1281_v40 = vmax.f32 %v1221_v36, 0.0 }
 0x212   : > { %v1313_v43 = vpack.c.bf16 %v1283_v35, %v1282_v37 }
 0x213   : > { %v1312_v34 = vpack.c.bf16 %v1281_v40, %v1280_v39  ;;  %v3550_v41 = vpop.f32.mrb[4].mxu1  ;;  %v1374_v39 = vpop.permute.xlu1 %1373 }
 0x214   : > { %v1242_v38 = vadd.f32 %v3550_v41, %v4561_v25  ;;  %v1233_v49 = vpop.f32.mrb[5].mxu1 }
 0x215   : > { %v1234_v14 = vadd.f32 %v1233_v49, %v4551_v20  ;;  %v3551_v4 = vpop.f32.mrb[6].mxu1  ;;  %3560 = vmatprep.subr.bf16.mxu0 %v1312_v34 }
 0x216   : > { %v1245_v10 = vadd.f32 %v3551_v4, %v4570_v30  ;;  %v1236_v17 = vpop.f32.mrb[7].mxu1  ;;  %3561 = vmatpush3.bf16.msra.mxu0 %v1312_v34  ;;  %v1286_v50 = vmax.f32 %v1242_v38, 0.0  ;;  %v1379_v4 = vpop.permute.xlu0 %1378 }
 0x217   : > { %v1237_v11 = vadd.f32 %v1236_v17, %v4553_v21  ;;  %3562 = vmatprep.subr.bf16.mxu0 %v1313_v43  ;;  %v1284_v0 = vmax.f32 %v1234_v14, 0.0 }
 0x218   : > { %v1287_v52 = vmax.f32 %v1245_v10, 0.0 }
 0x219   : > { %v1285_v53 = vmax.f32 %v1237_v11, 0.0 }
 0x21a   : > { %v1315_v56 = vpack.c.bf16 %v1287_v52, %v1286_v50  ;;  %3563 = vmatpush3.bf16.msra.mxu0 %v1313_v43  ;;  %v1384_v50 = vpop.permute.xlu1 %1383 }
 0x21b   : > { %v1314_v57 = vpack.c.bf16 %v1285_v53, %v1284_v0  ;;  %v3554_v25 = vpop.f32.mrb[8].mxu1 }
 0x21c   : > { %v1258_v59 = vadd.f32 %v3554_v25, %v4595_v48  ;;  %v1249_v20 = vpop.f32.mrb[9].mxu1 }
 0x21d   : > { %v1250_v60 = vadd.f32 %v1249_v20, %v4581_v46  ;;  %v3555_v62 = vpop.f32.mrb[10].mxu1  ;;  %3564 = vmatprep.subr.bf16.mxu0 %v1314_v57 }
 0x21e   : > { %v1261_v30 = vadd.f32 %v3555_v62, %v4600_v5  ;;  %v1252_v63 = vpop.f32.mrb[11].mxu1  ;;  %3565 = vmatpush3.bf16.msra.mxu0 %v1314_v57  ;;  %v1290_v3 = vmax.f32 %v1258_v59, 0.0 }
 0x21f   : > { %v1253_v21 = vadd.f32 %v1252_v63, %v4583_v47  ;;  %3566 = vmatprep.subr.bf16.mxu0 %v1315_v56  ;;  %v1288_v8 = vmax.f32 %v1250_v60, 0.0  ;;  %v1394_v60 = vpop.permute.xlu1 %1393 }
 0x220   : > { %v1291_v6 = vmax.f32 %v1261_v30, 0.0 }
 0x221   : > { %v1289_v51 = vmax.f32 %v1253_v21, 0.0 }
 0x222   : > { %v1317_v45 = vpack.c.bf16 %v1291_v6, %v1290_v3  ;;  %3567 = vmatpush3.bf16.msra.mxu0 %v1315_v56 }
 0x223   : > { %v1316_v9 = vpack.c.bf16 %v1289_v51, %v1288_v8  ;;  %v3558_v48 = vpop.f32.mrb[12].mxu1 }
 0x224   : > { %v1274_v15 = vadd.f32 %v3558_v48, %v4625_v55  ;;  %v1265_v46 = vpop.f32.mrb[13].mxu1  ;;  %v3853_v55 = vld [vmem:[%s4996_s4 + $0x18] sm:$0xff]  }
 0x225   : > { %v1266_v16 = vadd.f32 %v1265_v46, %v4613_v23  ;;  %v3559_v18 = vpop.f32.mrb[14].mxu1  ;;  %3568 = vmatprep.subr.bf16.mxu0 %v1316_v9  ;;  %v3851_v23 = vld [vmem:[%s4996_s4 + $0x8] sm:$0xff]  }
 0x226   : > { %v1277_v5 = vadd.f32 %v3559_v18, %v4631_v42  ;;  %v1268_v22 = vpop.f32.mrb[15].mxu1  ;;  %3569 = vmatpush3.bf16.msra.mxu0 %v1316_v9  ;;  %v1294_v24 = vmax.f32 %v1274_v15, 0.0  ;;  %v3854_v42 = vld [vmem:[%s4996_s4 + $0x20] sm:$0xff]  }
 0x227   : > { %v1269_v47 = vadd.f32 %v1268_v22, %v4616_v58  ;;  %3570 = vmatprep.subr.bf16.mxu0 %v1317_v45  ;;  %v1292_v27 = vmax.f32 %v1266_v16, 0.0  ;;  %v3852_v58 = vld [vmem:[%s4996_s4 + $0x10] sm:$0xff]   ;;  %s4889_s4 = scalar_lea.hbm %s4999_s3, %s3366_s25 }
 0x228   : > { %v1295_v26 = vmax.f32 %v1277_v5, 0.0 }
 0x229   : > { %v1293_v28 = vmax.f32 %v1269_v47, 0.0 }
 0x22a   : > { %v1319_v54 = vpack.c.bf16 %v1295_v26, %v1294_v24  ;;  %3571 = vmatpush3.bf16.msra.mxu0 %v1317_v45 }
 0x22b   : > { %v1318_v29 = vpack.c.bf16 %v1293_v28, %v1292_v27 }
 0x22d   : > { %3572 = vmatprep.subr.bf16.mxu0 %v1318_v29 }
 0x22e   : > { %3573 = vmatpush3.bf16.msra.mxu0 %v1318_v29 }
 0x22f   : > { %3574 = vmatprep.subr.bf16.mxu0 %v1319_v54 }
 0x232   : > { %3575 = vmatpush3.bf16.msra.mxu0 %v1319_v54 }
 0x235   : > { %3577 = vmatmul.mubr.bf16.vlgmr.msra.gmra.mrb[16].mxu0 %v3851_v23 }
 0x236   : > { %3580 = vmatprep.mubr.bf16.mxu0 %v3852_v58 }
 0x23d   : > { %3581 = vmatmul.mubr.bf16.gmra.mrb[20].mxu0 %v3853_v55 }
 0x23e   : > { %3584 = vmatprep.mubr.bf16.mxu0 %v3854_v42 }
 0x245   : > { %3585 = vmatmul.mubr.bf16.gmra.mrb[24].mxu0 %v3855_v31 }
 0x246   : > { %3588 = vmatprep.mubr.bf16.mxu0 %v3856_v32 }
 0x24d   : > { %3589 = vmatmul.mubr.bf16.gmra.mrb[28].mxu0 %v3857_v61 }
 0x308   : > { %v3578_v36 = vpop.f32.mrb[16].mxu0 }
 0x309   : > { %v1507_v37 = vadd.f32 %v3578_v36, %v4655_v2  ;;  %v1498_v35 = vpop.f32.mrb[17].mxu0 }
 0x30a   : > { %v1499_v40 = vadd.f32 %v1498_v35, %v4645_v7  ;;  %v3579_v43 = vpop.f32.mrb[18].mxu0  ;;  %v3860_v35 = vld [vmem:[%s4940_s7 + $0x10] sm:$0xff]  }
 0x30b   : > { %v1510_v34 = vadd.f32 %v3579_v43, %v4660_v44  ;;  %v1501_v41 = vpop.f32.mrb[19].mxu0  ;;  %v1563_v49 = vmax.f32 %v1507_v37, 0.0  ;;  %v3859_v37 = vld [vmem:[%s4940_s7 + $0x8] sm:$0xff]  }
 0x30c   : > { %v1502_v38 = vadd.f32 %v1501_v41, %v4647_v1  ;;  %v1561_v10 = vmax.f32 %v1499_v40, 0.0  ;;  %v1389_v1 = vpop.permute.xlu0 %1388  ;;  %v3862_v40 = vld [vmem:[%s4940_s7 + $0x20] sm:$0xff]   ;;  %v3863_v43 = vld [vmem:[%s4940_s7 + $0x28] sm:$0xff]   ;;  %v3865_v41 = vld [vmem:[%s4940_s7 + $0x38] sm:$0xff]  }
 0x30d   : > { %v1564_v14 = vmax.f32 %v1510_v34, 0.0  ;;  %v3864_v34 = vld [vmem:[%s4940_s7 + $0x30] sm:$0xff]  }
 0x30e   : > { %v1562_v17 = vmax.f32 %v1502_v38, 0.0  ;;  %v3866_v38 = vld [vmem:[%s4942_s9] sm:$0xff]  }
 0x30f   : > { %v1594_v11 = vpack.c.bf16 %v1564_v14, %v1563_v49  ;;  %3640 = vmatprep.mubr.bf16.mxu0 %v3866_v38 }
 0x310   : > { %v1593_v52 = vpack.c.bf16 %v1562_v17, %v1561_v10  ;;  %v3582_v0 = vpop.f32.mrb[20].mxu0  ;;  %v1399_v6 = vpop.permute.xlu0 %1398 }
 0x311   : > { %v1523_v2 = vadd.f32 %v3582_v0, %v4690_v19  ;;  %v1514_v53 = vpop.f32.mrb[21].mxu0 }
 0x312   : > { %v1515_v7 = vadd.f32 %v1514_v53, %v4677_v12  ;;  %v3583_v56 = vpop.f32.mrb[22].mxu0  ;;  %3592 = vmatprep.subr.bf16.mxu1 %v1593_v52 }
 0x313   : > { %v1526_v44 = vadd.f32 %v3583_v56, %v1374_v39  ;;  %v1517_v57 = vpop.f32.mrb[23].mxu0  ;;  %3593 = vmatpush3.bf16.msra.mxu1 %v1593_v52  ;;  %v1567_v59 = vmax.f32 %v1523_v2, 0.0  ;;  %v3861_v39 = vld [vmem:[%s4940_s7 + $0x18] sm:$0xff]  }
 0x314   : > { %v1518_v25 = vadd.f32 %v1517_v57, %v4679_v13  ;;  %3594 = vmatprep.subr.bf16.mxu1 %v1594_v11  ;;  %v1565_v62 = vmax.f32 %v1515_v7, 0.0  ;;  %v1404_v13 = vpop.permute.xlu1 %1403  ;;  %v1409_v22 = vpop.permute.xlu0 %1408 }
 0x315   : > { %v1568_v20 = vmax.f32 %v1526_v44, 0.0 }
 0x316   : > { %v1566_v30 = vmax.f32 %v1518_v25, 0.0 }
 0x317   : > { %v1596_v63 = vpack.c.bf16 %v1568_v20, %v1567_v59  ;;  %3595 = vmatpush3.bf16.msra.mxu1 %v1594_v11 }
 0x318   : > { %v1595_v19 = vpack.c.bf16 %v1566_v30, %v1565_v62  ;;  %v3586_v21 = vpop.f32.mrb[24].mxu0  ;;  %v1414_v28 = vpop.permute.xlu1 %1413 }
 0x319   : > { %v1539_v3 = vadd.f32 %v3586_v21, %v1389_v1  ;;  %v1530_v12 = vpop.f32.mrb[25].mxu0  ;;  %v1620_v49 = vpop.permute.xlu0 %1619 }
 0x31a   : > { %v1531_v8 = vadd.f32 %v1530_v12, %v1379_v4  ;;  %v3587_v51 = vpop.f32.mrb[26].mxu0  ;;  %3596 = vmatprep.subr.bf16.mxu1 %v1595_v19 }
 0x31b   : > { %v1542_v45 = vadd.f32 %v3587_v51, %v1394_v60  ;;  %v1533_v9 = vpop.f32.mrb[27].mxu0  ;;  %3597 = vmatpush3.bf16.msra.mxu1 %v1595_v19  ;;  %v1571_v15 = vmax.f32 %v1539_v3, 0.0 }
 0x31c   : > { %v1534_v48 = vadd.f32 %v1533_v9, %v1384_v50  ;;  %3598 = vmatprep.subr.bf16.mxu1 %v1596_v63  ;;  %v1569_v16 = vmax.f32 %v1531_v8, 0.0  ;;  %v1625_v14 = vpop.permute.xlu1 %1624 }
 0x31d   : > { %v1572_v46 = vmax.f32 %v1542_v45, 0.0  ;;  %v1630_v4 = vpop.permute.xlu0 %1629 }
 0x31e   : > { %v1570_v18 = vmax.f32 %v1534_v48, 0.0 }
 0x31f   : > { %v1598_v5 = vpack.c.bf16 %v1572_v46, %v1571_v15  ;;  %3599 = vmatpush3.bf16.msra.mxu1 %v1596_v63 }
 0x320   : > { %v1597_v47 = vpack.c.bf16 %v1570_v18, %v1569_v16  ;;  %v3590_v24 = vpop.f32.mrb[28].mxu0  ;;  %v1635_v10 = vpop.permute.xlu1 %1634 }
 0x321   : > { %v1555_v26 = vadd.f32 %v3590_v24, %v1409_v22  ;;  %v1546_v27 = vpop.f32.mrb[29].mxu0  ;;  %v1640_v17 = vpop.permute.xlu0 %1639 }
 0x322   : > { %v1547_v54 = vadd.f32 %v1546_v27, %v1399_v6  ;;  %v3591_v29 = vpop.f32.mrb[30].mxu0  ;;  %3600 = vmatprep.subr.bf16.mxu1 %v1597_v47 }
 0x323   : > { %v1558_v23 = vadd.f32 %v3591_v29, %v1414_v28  ;;  %v1549_v58 = vpop.f32.mrb[31].mxu0  ;;  %3601 = vmatpush3.bf16.msra.mxu1 %v1597_v47  ;;  %v1575_v42 = vmax.f32 %v1555_v26, 0.0 }
 0x324   : > { %v1550_v55 = vadd.f32 %v1549_v58, %v1404_v13  ;;  %3602 = vmatprep.subr.bf16.mxu1 %v1598_v5  ;;  %v1573_v32 = vmax.f32 %v1547_v54, 0.0  ;;  %v1645_v11 = vpop.permute.xlu1 %1644 }
 0x325   : > { %v1576_v31 = vmax.f32 %v1558_v23, 0.0  ;;  %v1650_v50 = vpop.permute.xlu0 %1649 }
 0x326   : > { %v1574_v61 = vmax.f32 %v1550_v55, 0.0 }
 0x327   : > { %v1600_v33 = vpack.c.bf16 %v1576_v31, %v1575_v42  ;;  %3603 = vmatpush3.bf16.msra.mxu1 %v1598_v5 }
 0x328   : > { %v1599_v36 = vpack.c.bf16 %v1574_v61, %v1573_v32  ;;  %v1655_v53 = vpop.permute.xlu1 %1654 }
 0x329   : > { %v1660_v20 = vpop.permute.xlu0 %1659 }
 0x32a   : > { %3604 = vmatprep.subr.bf16.mxu1 %v1599_v36 }
 0x32b   : > { %3605 = vmatpush3.bf16.msra.mxu1 %v1599_v36 }
 0x32c   : > { %3606 = vmatprep.subr.bf16.mxu1 %v1600_v33  ;;  %v1665_v63 = vpop.permute.xlu1 %1664 }
 0x32d   : > { %v1670_v9 = vpop.permute.xlu0 %1669 }
 0x32f   : > { %3607 = vmatpush3.bf16.msra.mxu1 %v1600_v33 }
 0x330   : > { %v1675_v46 = vpop.permute.xlu1 %1674 }
 0x331   : > { %v1680_v27 = vpop.permute.xlu0 %1679 }
 0x332   : > { %3609 = vmatmul.mubr.bf16.vlgmr.msra.gmra.mrb[16].mxu1 %v3859_v37 }
 0x333   : > { %3612 = vmatprep.mubr.bf16.mxu1 %v3860_v35 }
 0x334   : > { %v1685_v58 = vpop.permute.xlu1 %1684 }
 0x335   : > { %v1690_v36 = vpop.permute.xlu0 %1689 }
 0x33a   : > { %3613 = vmatmul.mubr.bf16.gmra.mrb[20].mxu1 %v3861_v39 }
 0x33b   : > { %3616 = vmatprep.mubr.bf16.mxu1 %v3862_v40 }
 0x342   : > { %3617 = vmatmul.mubr.bf16.gmra.mrb[24].mxu1 %v3863_v43  ;;  %v1695_v43 = vpop.permute.xlu1 %1694 }
 0x343   : > { %3620 = vmatprep.mubr.bf16.mxu1 %v3864_v34 }
 0x34a   : > { %3621 = vmatmul.mubr.bf16.gmra.mrb[28].mxu1 %v3865_v41 }
 0x405   : > { %v3610_v52 = vpop.f32.mrb[16].mxu1 }
 0x406   : > { %v1788_v0 = vadd.f32 %v3610_v52, %v1630_v4  ;;  %v1779_v2 = vpop.f32.mrb[17].mxu1 }
 0x407   : > { %v1780_v7 = vadd.f32 %v1779_v2, %v1620_v49  ;;  %v3611_v56 = vpop.f32.mrb[18].mxu1  ;;  %v3868_v2 = vld [vmem:[%s4942_s9 + $0x10] sm:$0xff]  }
 0x408   : > { %v1791_v44 = vadd.f32 %v3611_v56, %v1635_v10  ;;  %v1782_v57 = vpop.f32.mrb[19].mxu1  ;;  %v1844_v25 = vmax.f32 %v1788_v0, 0.0  ;;  %v3867_v0 = vld [vmem:[%s4942_s9 + $0x8] sm:$0xff]  }
 0x409   : > { %v1783_v1 = vadd.f32 %v1782_v57, %v1625_v14  ;;  %v1842_v60 = vmax.f32 %v1780_v7, 0.0  ;;  %v3870_v7 = vld [vmem:[%s4942_s9 + $0x20] sm:$0xff]   ;;  %v3871_v56 = vld [vmem:[%s4942_s9 + $0x28] sm:$0xff]   ;;  %v3873_v57 = vld [vmem:[%s4942_s9 + $0x38] sm:$0xff]  }
 0x40a   : > { %v1845_v59 = vmax.f32 %v1791_v44, 0.0  ;;  %v3872_v44 = vld [vmem:[%s4942_s9 + $0x30] sm:$0xff]  }
 0x40b   : > { %v1843_v62 = vmax.f32 %v1783_v1, 0.0  ;;  %v3874_v1 = vld [vmem:[%s4944_s11] sm:$0xff]  }
 0x40c   : > { %v1875_v30 = vpack.c.bf16 %v1845_v59, %v1844_v25  ;;  %3672 = vmatprep.mubr.bf16.mxu1 %v3874_v1  ;;  %v1901_v25 = vpop.permute.xlu0 %1900  ;;  %v1906_v59 = vpop.permute.xlu1 %1905 }
 0x40d   : > { %v1874_v19 = vpack.c.bf16 %v1843_v62, %v1842_v60  ;;  %v3614_v21 = vpop.f32.mrb[20].mxu1 }
 0x40e   : > { %v1804_v3 = vadd.f32 %v3614_v21, %v1650_v50  ;;  %v1795_v12 = vpop.f32.mrb[21].mxu1 }
 0x40f   : > { %v1796_v6 = vadd.f32 %v1795_v12, %v1640_v17  ;;  %v3615_v8 = vpop.f32.mrb[22].mxu1  ;;  %3624 = vmatprep.subr.bf16.mxu0 %v1874_v19 }
 0x410   : > { %v1807_v51 = vadd.f32 %v3615_v8, %v1655_v53  ;;  %v1798_v45 = vpop.f32.mrb[23].mxu1  ;;  %3625 = vmatpush3.bf16.msra.mxu0 %v1874_v19  ;;  %v1848_v48 = vmax.f32 %v1804_v3, 0.0  ;;  %v3869_v53 = vld [vmem:[%s4942_s9 + $0x18] sm:$0xff]   ;;  %v1916_v60 = vpop.permute.xlu1 %1915 }
 0x411   : > { %v1799_v13 = vadd.f32 %v1798_v45, %v1645_v11  ;;  %3626 = vmatprep.subr.bf16.mxu0 %v1875_v30  ;;  %v1846_v16 = vmax.f32 %v1796_v6, 0.0 }
 0x412   : > { %v1849_v15 = vmax.f32 %v1807_v51, 0.0 }
 0x413   : > { %v1847_v18 = vmax.f32 %v1799_v13, 0.0 }
 0x414   : > { %v1877_v5 = vpack.c.bf16 %v1849_v15, %v1848_v48  ;;  %3627 = vmatpush3.bf16.msra.mxu0 %v1875_v30  ;;  %v1926_v30 = vpop.permute.xlu1 %1925 }
 0x415   : > { %v1876_v22 = vpack.c.bf16 %v1847_v18, %v1846_v16  ;;  %v3618_v47 = vpop.f32.mrb[24].mxu1 }
 0x416   : > { %v1820_v24 = vadd.f32 %v3618_v47, %v1670_v9  ;;  %v1811_v26 = vpop.f32.mrb[25].mxu1 }
 0x417   : > { %v1812_v28 = vadd.f32 %v1811_v26, %v1660_v20  ;;  %v3619_v54 = vpop.f32.mrb[26].mxu1  ;;  %3628 = vmatprep.subr.bf16.mxu0 %v1876_v22  ;;  %v1911_v20 = vpop.permute.xlu0 %1910 }
 0x418   : > { %v1823_v29 = vadd.f32 %v3619_v54, %v1675_v46  ;;  %v1814_v23 = vpop.f32.mrb[27].mxu1  ;;  %3629 = vmatpush3.bf16.msra.mxu0 %v1876_v22  ;;  %v1852_v42 = vmax.f32 %v1820_v24, 0.0  ;;  %v1936_v12 = vpop.permute.xlu1 %1935 }
 0x419   : > { %v1815_v55 = vadd.f32 %v1814_v23, %v1665_v63  ;;  %3630 = vmatprep.subr.bf16.mxu0 %v1877_v5  ;;  %v1850_v32 = vmax.f32 %v1812_v28, 0.0 }
 0x41a   : > { %v1853_v31 = vmax.f32 %v1823_v29, 0.0 }
 0x41b   : > { %v1851_v61 = vmax.f32 %v1815_v55, 0.0  ;;  %v1921_v62 = vpop.permute.xlu0 %1920 }
 0x41c   : > { %v1879_v33 = vpack.c.bf16 %v1853_v31, %v1852_v42  ;;  %3631 = vmatpush3.bf16.msra.mxu0 %v1877_v5  ;;  %v1946_v5 = vpop.permute.xlu1 %1945 }
 0x41d   : > { %v1878_v37 = vpack.c.bf16 %v1851_v61, %v1850_v32  ;;  %v3622_v35 = vpop.f32.mrb[28].mxu1 }
 0x41e   : > { %v1836_v39 = vadd.f32 %v3622_v35, %v1690_v36  ;;  %v1827_v40 = vpop.f32.mrb[29].mxu1 }
 0x41f   : > { %v1828_v34 = vadd.f32 %v1827_v40, %v1680_v27  ;;  %v3623_v41 = vpop.f32.mrb[30].mxu1  ;;  %3632 = vmatprep.subr.bf16.mxu0 %v1878_v37  ;;  %v1931_v63 = vpop.permute.xlu0 %1930 }
 0x420   : > { %v1839_v38 = vadd.f32 %v3623_v41, %v1695_v43  ;;  %v1830_v49 = vpop.f32.mrb[31].mxu1  ;;  %3633 = vmatpush3.bf16.msra.mxu0 %v1878_v37  ;;  %v1856_v4 = vmax.f32 %v1836_v39, 0.0  ;;  %v1956_v31 = vpop.permute.xlu1 %1955 }
 0x421   : > { %v1831_v14 = vadd.f32 %v1830_v49, %v1685_v58  ;;  %3634 = vmatprep.subr.bf16.mxu0 %v1879_v33  ;;  %v1854_v17 = vmax.f32 %v1828_v34, 0.0 }
 0x422   : > { %v1857_v10 = vmax.f32 %v1839_v38, 0.0 }
 0x423   : > { %v1855_v11 = vmax.f32 %v1831_v14, 0.0  ;;  %v1941_v15 = vpop.permute.xlu0 %1940 }
 0x424   : > { %v1881_v50 = vpack.c.bf16 %v1857_v10, %v1856_v4  ;;  %3635 = vmatpush3.bf16.msra.mxu0 %v1879_v33  ;;  %v1966_v49 = vpop.permute.xlu1 %1965 }
 0x425   : > { %v1880_v52 = vpack.c.bf16 %v1855_v11, %v1854_v17 }
 0x427   : > { %3636 = vmatprep.subr.bf16.mxu0 %v1880_v52  ;;  %v1951_v23 = vpop.permute.xlu0 %1950 }
 0x428   : > { %3637 = vmatpush3.bf16.msra.mxu0 %v1880_v52 }
 0x429   : > { %3638 = vmatprep.subr.bf16.mxu0 %v1881_v50 }
 0x42b   : > { %v1961_v40 = vpop.permute.xlu0 %1960 }
 0x42c   : > { %3639 = vmatpush3.bf16.msra.mxu0 %v1881_v50 }
 0x42f   : > { %3641 = vmatmul.mubr.bf16.vlgmr.msra.gmra.mrb[32].mxu0 %v3867_v0  ;;  %v1971_v52 = vpop.permute.xlu0 %1970 }
 0x430   : > { %3644 = vmatprep.mubr.bf16.mxu0 %v3868_v2 }
 0x437   : > { %3645 = vmatmul.mubr.bf16.gmra.mrb[36].mxu0 %v3869_v53 }
 0x438   : > { %3648 = vmatprep.mubr.bf16.mxu0 %v3870_v7 }
 0x43f   : > { %3649 = vmatmul.mubr.bf16.gmra.mrb[40].mxu0 %v3871_v56  ;;  %v1976_v56 = vpop.permute.xlu1 %1975 }
 0x440   : > { %3652 = vmatprep.mubr.bf16.mxu0 %v3872_v44 }
 0x447   : > { %3653 = vmatmul.mubr.bf16.gmra.mrb[44].mxu0 %v3873_v57 }
 0x502   : > { %v3642_v19 = vpop.f32.mrb[32].mxu0 }
 0x503   : > { %v2069_v21 = vadd.f32 %v3642_v19, %v1911_v20  ;;  %v2060_v3 = vpop.f32.mrb[33].mxu0 }
 0x504   : > { %v2061_v6 = vadd.f32 %v2060_v3, %v1901_v25  ;;  %v3643_v8 = vpop.f32.mrb[34].mxu0  ;;  %v3876_v3 = vld [vmem:[%s4944_s11 + $0x10] sm:$0xff]  }
 0x505   : > { %v2072_v51 = vadd.f32 %v3643_v8, %v1916_v60  ;;  %v2063_v45 = vpop.f32.mrb[35].mxu0  ;;  %v2125_v13 = vmax.f32 %v2069_v21, 0.0  ;;  %v3875_v21 = vld [vmem:[%s4944_s11 + $0x8] sm:$0xff]  }
 0x506   : > { %v2064_v9 = vadd.f32 %v2063_v45, %v1906_v59  ;;  %v2123_v46 = vmax.f32 %v2061_v6, 0.0  ;;  %v3878_v6 = vld [vmem:[%s4944_s11 + $0x20] sm:$0xff]   ;;  %v3879_v8 = vld [vmem:[%s4944_s11 + $0x28] sm:$0xff]   ;;  %v3881_v45 = vld [vmem:[%s4944_s11 + $0x38] sm:$0xff]  }
 0x507   : > { %v2126_v48 = vmax.f32 %v2072_v51, 0.0  ;;  %v3880_v51 = vld [vmem:[%s4944_s11 + $0x30] sm:$0xff]  }
 0x508   : > { %v2124_v16 = vmax.f32 %v2064_v9, 0.0  ;;  %v3882_v9 = vld [vmem:[%s4946_s13] sm:$0xff]  }
 0x509   : > { %v2156_v18 = vpack.c.bf16 %v2126_v48, %v2125_v13  ;;  %3704 = vmatprep.mubr.bf16.mxu0 %v3882_v9  ;;  %v2182_v13 = vpop.permute.xlu0 %2181  ;;  %v2187_v48 = vpop.permute.xlu1 %2186 }
 0x50a   : > { %v2155_v22 = vpack.c.bf16 %v2124_v16, %v2123_v46  ;;  %v3646_v47 = vpop.f32.mrb[36].mxu0 }
 0x50b   : > { %v2085_v24 = vadd.f32 %v3646_v47, %v1931_v63  ;;  %v2076_v26 = vpop.f32.mrb[37].mxu0 }
 0x50c   : > { %v2077_v27 = vadd.f32 %v2076_v26, %v1921_v62  ;;  %v3647_v28 = vpop.f32.mrb[38].mxu0  ;;  %3656 = vmatprep.subr.bf16.mxu1 %v2155_v22 }
 0x50d   : > { %v2088_v54 = vadd.f32 %v3647_v28, %v1936_v12  ;;  %v2079_v29 = vpop.f32.mrb[39].mxu0  ;;  %3657 = vmatpush3.bf16.msra.mxu1 %v2155_v22  ;;  %v2129_v55 = vmax.f32 %v2085_v24, 0.0  ;;  %v3877_v12 = vld [vmem:[%s4944_s11 + $0x18] sm:$0xff]   ;;  %v2197_v46 = vpop.permute.xlu1 %2196 }
 0x50e   : > { %v2080_v58 = vadd.f32 %v2079_v29, %v1926_v30  ;;  %3658 = vmatprep.subr.bf16.mxu1 %v2156_v18  ;;  %v2127_v32 = vmax.f32 %v2077_v27, 0.0 }
 0x50f   : > { %v2130_v42 = vmax.f32 %v2088_v54, 0.0 }
 0x510   : > { %v2128_v61 = vmax.f32 %v2080_v58, 0.0 }
 0x511   : > { %v2158_v33 = vpack.c.bf16 %v2130_v42, %v2129_v55  ;;  %3659 = vmatpush3.bf16.msra.mxu1 %v2156_v18  ;;  %v2207_v18 = vpop.permute.xlu1 %2206 }
 0x512   : > { %v2157_v36 = vpack.c.bf16 %v2128_v61, %v2127_v32  ;;  %v3650_v37 = vpop.f32.mrb[40].mxu0 }
 0x513   : > { %v2101_v35 = vadd.f32 %v3650_v37, %v1951_v23  ;;  %v2092_v39 = vpop.f32.mrb[41].mxu0 }
 0x514   : > { %v2093_v43 = vadd.f32 %v2092_v39, %v1941_v15  ;;  %v3651_v34 = vpop.f32.mrb[42].mxu0  ;;  %3660 = vmatprep.subr.bf16.mxu1 %v2157_v36  ;;  %v2192_v15 = vpop.permute.xlu0 %2191 }
 0x515   : > { %v2104_v41 = vadd.f32 %v3651_v34, %v1956_v31  ;;  %v2095_v38 = vpop.f32.mrb[43].mxu0  ;;  %3661 = vmatpush3.bf16.msra.mxu1 %v2157_v36  ;;  %v2133_v4 = vmax.f32 %v2101_v35, 0.0  ;;  %v2217_v26 = vpop.permute.xlu1 %2216 }
 0x516   : > { %v2096_v14 = vadd.f32 %v2095_v38, %v1946_v5  ;;  %3662 = vmatprep.subr.bf16.mxu1 %v2158_v33  ;;  %v2131_v17 = vmax.f32 %v2093_v43, 0.0 }
 0x517   : > { %v2134_v10 = vmax.f32 %v2104_v41, 0.0 }
 0x518   : > { %v2132_v11 = vmax.f32 %v2096_v14, 0.0  ;;  %v2202_v16 = vpop.permute.xlu0 %2201 }
 0x519   : > { %v2160_v50 = vpack.c.bf16 %v2134_v10, %v2133_v4  ;;  %3663 = vmatpush3.bf16.msra.mxu1 %v2158_v33  ;;  %v2227_v33 = vpop.permute.xlu1 %2226 }
 0x51a   : > { %v2159_v0 = vpack.c.bf16 %v2132_v11, %v2131_v17  ;;  %v3654_v2 = vpop.f32.mrb[44].mxu0 }
 0x51b   : > { %v2117_v53 = vadd.f32 %v3654_v2, %v1971_v52  ;;  %v2108_v7 = vpop.f32.mrb[45].mxu0 }
 0x51c   : > { %v2109_v44 = vadd.f32 %v2108_v7, %v1961_v40  ;;  %v3655_v57 = vpop.f32.mrb[46].mxu0  ;;  %3664 = vmatprep.subr.bf16.mxu1 %v2159_v0  ;;  %v2212_v5 = vpop.permute.xlu0 %2211 }
 0x51d   : > { %v2120_v1 = vadd.f32 %v3655_v57, %v1976_v56  ;;  %v2111_v25 = vpop.f32.mrb[47].mxu0  ;;  %3665 = vmatpush3.bf16.msra.mxu1 %v2159_v0  ;;  %v2137_v20 = vmax.f32 %v2117_v53, 0.0  ;;  %v2237_v10 = vpop.permute.xlu1 %2236 }
 0x51e   : > { %v2112_v59 = vadd.f32 %v2111_v25, %v1966_v49  ;;  %3666 = vmatprep.subr.bf16.mxu1 %v2160_v50  ;;  %v2135_v62 = vmax.f32 %v2109_v44, 0.0 }
 0x51f   : > { %v2138_v60 = vmax.f32 %v2120_v1, 0.0 }
 0x520   : > { %v2136_v30 = vmax.f32 %v2112_v59, 0.0  ;;  %v2222_v42 = vpop.permute.xlu0 %2221 }
 0x521   : > { %v2162_v63 = vpack.c.bf16 %v2138_v60, %v2137_v20  ;;  %3667 = vmatpush3.bf16.msra.mxu1 %v2160_v50  ;;  %v2247_v25 = vpop.permute.xlu1 %2246 }
 0x522   : > { %v2161_v19 = vpack.c.bf16 %v2136_v30, %v2135_v62 }
 0x524   : > { %3668 = vmatprep.subr.bf16.mxu1 %v2161_v19  ;;  %v2232_v38 = vpop.permute.xlu0 %2231 }
 0x525   : > { %3669 = vmatpush3.bf16.msra.mxu1 %v2161_v19 }
 0x526   : > { %3670 = vmatprep.subr.bf16.mxu1 %v2162_v63 }
 0x528   : > { %v2242_v7 = vpop.permute.xlu0 %2241 }
 0x529   : > { %3671 = vmatpush3.bf16.msra.mxu1 %v2162_v63 }
 0x52c   : > { %3673 = vmatmul.mubr.bf16.vlgmr.msra.gmra.mrb[32].mxu1 %v3875_v21  ;;  %v2252_v19 = vpop.permute.xlu0 %2251 }
 0x52d   : > { %3676 = vmatprep.mubr.bf16.mxu1 %v3876_v3 }
 0x534   : > { %3677 = vmatmul.mubr.bf16.gmra.mrb[36].mxu1 %v3877_v12 }
 0x535   : > { %3680 = vmatprep.mubr.bf16.mxu1 %v3878_v6 }
 0x53c   : > { %3681 = vmatmul.mubr.bf16.gmra.mrb[40].mxu1 %v3879_v8  ;;  %v2257_v8 = vpop.permute.xlu1 %2256 }
 0x53d   : > { %3684 = vmatprep.mubr.bf16.mxu1 %v3880_v51 }
 0x544   : > { %3685 = vmatmul.mubr.bf16.gmra.mrb[44].mxu1 %v3881_v45 }
 0x5ff   : > { %v3674_v22 = vpop.f32.mrb[32].mxu1 }
 0x600   : > { %v2350_v47 = vadd.f32 %v3674_v22, %v2192_v15  ;;  %v2341_v24 = vpop.f32.mrb[33].mxu1 }
 0x601   : > { %v2342_v27 = vadd.f32 %v2341_v24, %v2182_v13  ;;  %v3675_v28 = vpop.f32.mrb[34].mxu1  ;;  %v3884_v24 = vld [vmem:[%s4946_s13 + $0x10] sm:$0xff]  }
 0x602   : > { %v2353_v54 = vadd.f32 %v3675_v28, %v2197_v46  ;;  %v2344_v29 = vpop.f32.mrb[35].mxu1  ;;  %v2406_v58 = vmax.f32 %v2350_v47, 0.0  ;;  %v3883_v47 = vld [vmem:[%s4946_s13 + $0x8] sm:$0xff]  }
 0x603   : > { %v2345_v23 = vadd.f32 %v2344_v29, %v2187_v48  ;;  %v2404_v31 = vmax.f32 %v2342_v27, 0.0  ;;  %v3886_v27 = vld [vmem:[%s4946_s13 + $0x20] sm:$0xff]   ;;  %v3887_v28 = vld [vmem:[%s4946_s13 + $0x28] sm:$0xff]   ;;  %v3889_v29 = vld [vmem:[%s4946_s13 + $0x38] sm:$0xff]  }
 0x604   : > { %v2407_v55 = vmax.f32 %v2353_v54, 0.0  ;;  %v3888_v54 = vld [vmem:[%s4946_s13 + $0x30] sm:$0xff]  }
 0x605   : > { %v2405_v32 = vmax.f32 %v2345_v23, 0.0  ;;  %v3890_v23 = vld [vmem:[%s4948_s15] sm:$0xff]  }
 0x606   : > { %v2437_v61 = vpack.c.bf16 %v2407_v55, %v2406_v58  ;;  %3736 = vmatprep.mubr.bf16.mxu1 %v3890_v23  ;;  %v2463_v58 = vpop.permute.xlu0 %2462  ;;  %v2468_v55 = vpop.permute.xlu1 %2467 }
 0x607   : > { %v2436_v36 = vpack.c.bf16 %v2405_v32, %v2404_v31  ;;  %v3678_v37 = vpop.f32.mrb[36].mxu1 }
 0x608   : > { %v2366_v35 = vadd.f32 %v3678_v37, %v2212_v5  ;;  %v2357_v39 = vpop.f32.mrb[37].mxu1 }
 0x609   : > { %v2358_v40 = vadd.f32 %v2357_v39, %v2202_v16  ;;  %v3679_v43 = vpop.f32.mrb[38].mxu1  ;;  %3688 = vmatprep.subr.bf16.mxu0 %v2436_v36 }
 0x60a   : > { %v2369_v34 = vadd.f32 %v3679_v43, %v2217_v26  ;;  %v2360_v41 = vpop.f32.mrb[39].mxu1  ;;  %3689 = vmatpush3.bf16.msra.mxu0 %v2436_v36  ;;  %v2410_v14 = vmax.f32 %v2366_v35, 0.0  ;;  %v3885_v26 = vld [vmem:[%s4946_s13 + $0x18] sm:$0xff]   ;;  %v2478_v31 = vpop.permute.xlu1 %2477 }
 0x60b   : > { %v2361_v49 = vadd.f32 %v2360_v41, %v2207_v18  ;;  %3690 = vmatprep.subr.bf16.mxu0 %v2437_v61  ;;  %v2408_v17 = vmax.f32 %v2358_v40, 0.0 }
 0x60c   : > { %v2411_v4 = vmax.f32 %v2369_v34, 0.0 }
 0x60d   : > { %v2409_v11 = vmax.f32 %v2361_v49, 0.0 }
 0x60e   : > { %v2439_v50 = vpack.c.bf16 %v2411_v4, %v2410_v14  ;;  %3691 = vmatpush3.bf16.msra.mxu0 %v2437_v61  ;;  %v2488_v61 = vpop.permute.xlu1 %2487 }
 0x60f   : > { %v2438_v52 = vpack.c.bf16 %v2409_v11, %v2408_v17  ;;  %v3682_v0 = vpop.f32.mrb[40].mxu1 }
 0x610   : > { %v2382_v2 = vadd.f32 %v3682_v0, %v2232_v38  ;;  %v2373_v53 = vpop.f32.mrb[41].mxu1 }
 0x611   : > { %v2374_v56 = vadd.f32 %v2373_v53, %v2222_v42  ;;  %v3683_v44 = vpop.f32.mrb[42].mxu1  ;;  %3692 = vmatprep.subr.bf16.mxu0 %v2438_v52  ;;  %v2473_v42 = vpop.permute.xlu0 %2472 }
 0x612   : > { %v2385_v57 = vadd.f32 %v3683_v44, %v2237_v10  ;;  %v2376_v1 = vpop.f32.mrb[43].mxu1  ;;  %3693 = vmatpush3.bf16.msra.mxu0 %v2438_v52  ;;  %v2414_v20 = vmax.f32 %v2382_v2, 0.0  ;;  %v2498_v39 = vpop.permute.xlu1 %2497 }
 0x613   : > { %v2377_v59 = vadd.f32 %v2376_v1, %v2227_v33  ;;  %3694 = vmatprep.subr.bf16.mxu0 %v2439_v50  ;;  %v2412_v62 = vmax.f32 %v2374_v56, 0.0 }
 0x614   : > { %v2415_v60 = vmax.f32 %v2385_v57, 0.0 }
 0x615   : > { %v2413_v30 = vmax.f32 %v2377_v59, 0.0  ;;  %v2483_v32 = vpop.permute.xlu0 %2482 }
 0x616   : > { %v2441_v63 = vpack.c.bf16 %v2415_v60, %v2414_v20  ;;  %3695 = vmatpush3.bf16.msra.mxu0 %v2439_v50  ;;  %v2508_v50 = vpop.permute.xlu1 %2507 }
 0x617   : > { %v2440_v21 = vpack.c.bf16 %v2413_v30, %v2412_v62  ;;  %v3686_v3 = vpop.f32.mrb[44].mxu1 }
 0x618   : > { %v2398_v12 = vadd.f32 %v3686_v3, %v2252_v19  ;;  %v2389_v6 = vpop.f32.mrb[45].mxu1 }
 0x619   : > { %v2390_v51 = vadd.f32 %v2389_v6, %v2242_v7  ;;  %v3687_v45 = vpop.f32.mrb[46].mxu1  ;;  %3696 = vmatprep.subr.bf16.mxu0 %v2440_v21  ;;  %v2493_v33 = vpop.permute.xlu0 %2492 }
 0x61a   : > { %v2401_v9 = vadd.f32 %v3687_v45, %v2257_v8  ;;  %v2392_v13 = vpop.f32.mrb[47].mxu1  ;;  %3697 = vmatpush3.bf16.msra.mxu0 %v2440_v21  ;;  %v2418_v15 = vmax.f32 %v2398_v12, 0.0  ;;  %v2518_v60 = vpop.permute.xlu1 %2517 }
 0x61b   : > { %v2393_v48 = vadd.f32 %v2392_v13, %v2247_v25  ;;  %3698 = vmatprep.subr.bf16.mxu0 %v2441_v63  ;;  %v2416_v16 = vmax.f32 %v2390_v51, 0.0 }
 0x61c   : > { %v2419_v46 = vmax.f32 %v2401_v9, 0.0 }
 0x61d   : > { %v2417_v18 = vmax.f32 %v2393_v48, 0.0  ;;  %v2503_v4 = vpop.permute.xlu0 %2502 }
 0x61e   : > { %v2443_v5 = vpack.c.bf16 %v2419_v46, %v2418_v15  ;;  %3699 = vmatpush3.bf16.msra.mxu0 %v2441_v63  ;;  %v2528_v13 = vpop.permute.xlu1 %2527 }
 0x61f   : > { %v2442_v22 = vpack.c.bf16 %v2417_v18, %v2416_v16 }
 0x621   : > { %3700 = vmatprep.subr.bf16.mxu0 %v2442_v22  ;;  %v2513_v1 = vpop.permute.xlu0 %2512 }
 0x622   : > { %3701 = vmatpush3.bf16.msra.mxu0 %v2442_v22 }
 0x623   : > { %3702 = vmatprep.subr.bf16.mxu0 %v2443_v5 }
 0x625   : > { %v2523_v6 = vpop.permute.xlu0 %2522 }
 0x626   : > { %3703 = vmatpush3.bf16.msra.mxu0 %v2443_v5 }
 0x629   : > { %3705 = vmatmul.mubr.bf16.vlgmr.msra.gmra.mrb[48].mxu0 %v3883_v47  ;;  %v2533_v22 = vpop.permute.xlu0 %2532 }
 0x62a   : > { %3708 = vmatprep.mubr.bf16.mxu0 %v3884_v24 }
 0x631   : > { %3709 = vmatmul.mubr.bf16.gmra.mrb[52].mxu0 %v3885_v26 }
 0x632   : > { %3712 = vmatprep.mubr.bf16.mxu0 %v3886_v27 }
 0x639   : > { %3713 = vmatmul.mubr.bf16.gmra.mrb[56].mxu0 %v3887_v28  ;;  %v2538_v28 = vpop.permute.xlu1 %2537 }
 0x63a   : > { %3716 = vmatprep.mubr.bf16.mxu0 %v3888_v54 }
 0x641   : > { %3717 = vmatmul.mubr.bf16.gmra.mrb[60].mxu0 %v3889_v29 }
 0x6fc   : > { %v3706_v36 = vpop.f32.mrb[48].mxu0 }
 0x6fd   : > { %v2631_v37 = vadd.f32 %v3706_v36, %v2473_v42  ;;  %v2622_v35 = vpop.f32.mrb[49].mxu0 }
 0x6fe   : > { %v2623_v40 = vadd.f32 %v2622_v35, %v2463_v58  ;;  %v3707_v43 = vpop.f32.mrb[50].mxu0  ;;  %v3892_v35 = vld [vmem:[%s4948_s15 + $0x10] sm:$0xff]  }
 0x6ff   : > { %v2634_v34 = vadd.f32 %v3707_v43, %v2478_v31  ;;  %v2625_v41 = vpop.f32.mrb[51].mxu0  ;;  %v2687_v49 = vmax.f32 %v2631_v37, 0.0  ;;  %v3891_v37 = vld [vmem:[%s4948_s15 + $0x8] sm:$0xff]  }
 0x700   : > { %v2626_v38 = vadd.f32 %v2625_v41, %v2468_v55  ;;  %v2685_v10 = vmax.f32 %v2623_v40, 0.0  ;;  %v3894_v40 = vld [vmem:[%s4948_s15 + $0x20] sm:$0xff]   ;;  %v3895_v43 = vld [vmem:[%s4948_s15 + $0x28] sm:$0xff]   ;;  %v3897_v41 = vld [vmem:[%s4948_s15 + $0x38] sm:$0xff]  }
 0x701   : > { %v2688_v14 = vmax.f32 %v2634_v34, 0.0  ;;  %v3896_v34 = vld [vmem:[%s4948_s15 + $0x30] sm:$0xff]  }
 0x702   : > { %v2686_v17 = vmax.f32 %v2626_v38, 0.0  ;;  %v3898_v38 = vld [vmem:[%s4950_s17] sm:$0xff]  }
 0x703   : > { %v2718_v11 = vpack.c.bf16 %v2688_v14, %v2687_v49  ;;  %3768 = vmatprep.mubr.bf16.mxu0 %v3898_v38  ;;  %v2744_v49 = vpop.permute.xlu0 %2743  ;;  %v2749_v14 = vpop.permute.xlu1 %2748 }
 0x704   : > { %v2717_v52 = vpack.c.bf16 %v2686_v17, %v2685_v10  ;;  %v3710_v0 = vpop.f32.mrb[52].mxu0 }
 0x705   : > { %v2647_v2 = vadd.f32 %v3710_v0, %v2493_v33  ;;  %v2638_v53 = vpop.f32.mrb[53].mxu0 }
 0x706   : > { %v2639_v7 = vadd.f32 %v2638_v53, %v2483_v32  ;;  %v3711_v56 = vpop.f32.mrb[54].mxu0  ;;  %3720 = vmatprep.subr.bf16.mxu1 %v2717_v52 }
 0x707   : > { %v2650_v44 = vadd.f32 %v3711_v56, %v2498_v39  ;;  %v2641_v57 = vpop.f32.mrb[55].mxu0  ;;  %3721 = vmatpush3.bf16.msra.mxu1 %v2717_v52  ;;  %v2691_v59 = vmax.f32 %v2647_v2, 0.0  ;;  %v3893_v39 = vld [vmem:[%s4948_s15 + $0x18] sm:$0xff]   ;;  %v2759_v10 = vpop.permute.xlu1 %2758 }
 0x708   : > { %v2642_v25 = vadd.f32 %v2641_v57, %v2488_v61  ;;  %3722 = vmatprep.subr.bf16.mxu1 %v2718_v11  ;;  %v2689_v62 = vmax.f32 %v2639_v7, 0.0 }
 0x709   : > { %v2692_v20 = vmax.f32 %v2650_v44, 0.0 }
 0x70a   : > { %v2690_v30 = vmax.f32 %v2642_v25, 0.0 }
 0x70b   : > { %v2720_v63 = vpack.c.bf16 %v2692_v20, %v2691_v59  ;;  %3723 = vmatpush3.bf16.msra.mxu1 %v2718_v11  ;;  %v2769_v11 = vpop.permute.xlu1 %2768 }
 0x70c   : > { %v2719_v19 = vpack.c.bf16 %v2690_v30, %v2689_v62  ;;  %v3714_v21 = vpop.f32.mrb[56].mxu0 }
 0x70d   : > { %v2663_v3 = vadd.f32 %v3714_v21, %v2513_v1  ;;  %v2654_v12 = vpop.f32.mrb[57].mxu0 }
 0x70e   : > { %v2655_v8 = vadd.f32 %v2654_v12, %v2503_v4  ;;  %v3715_v51 = vpop.f32.mrb[58].mxu0  ;;  %3724 = vmatprep.subr.bf16.mxu1 %v2719_v19  ;;  %v2754_v4 = vpop.permute.xlu0 %2753 }
 0x70f   : > { %v2666_v45 = vadd.f32 %v3715_v51, %v2518_v60  ;;  %v2657_v9 = vpop.f32.mrb[59].mxu0  ;;  %3725 = vmatpush3.bf16.msra.mxu1 %v2719_v19  ;;  %v2695_v15 = vmax.f32 %v2663_v3, 0.0  ;;  %v2779_v53 = vpop.permute.xlu1 %2778 }
 0x710   : > { %v2658_v48 = vadd.f32 %v2657_v9, %v2508_v50  ;;  %3726 = vmatprep.subr.bf16.mxu1 %v2720_v63  ;;  %v2693_v16 = vmax.f32 %v2655_v8, 0.0 }
 0x711   : > { %v2696_v46 = vmax.f32 %v2666_v45, 0.0 }
 0x712   : > { %v2694_v18 = vmax.f32 %v2658_v48, 0.0  ;;  %v2764_v17 = vpop.permute.xlu0 %2763 }
 0x713   : > { %v2722_v5 = vpack.c.bf16 %v2696_v46, %v2695_v15  ;;  %3727 = vmatpush3.bf16.msra.mxu1 %v2720_v63  ;;  %v2789_v63 = vpop.permute.xlu1 %2788 }
 0x714   : > { %v2721_v47 = vpack.c.bf16 %v2694_v18, %v2693_v16  ;;  %v3718_v24 = vpop.f32.mrb[60].mxu0 }
 0x715   : > { %v2679_v26 = vadd.f32 %v3718_v24, %v2533_v22  ;;  %v2670_v27 = vpop.f32.mrb[61].mxu0 }
 0x716   : > { %v2671_v54 = vadd.f32 %v2670_v27, %v2523_v6  ;;  %v3719_v29 = vpop.f32.mrb[62].mxu0  ;;  %3728 = vmatprep.subr.bf16.mxu1 %v2721_v47  ;;  %v2774_v50 = vpop.permute.xlu0 %2773 }
 0x717   : > { %v2682_v23 = vadd.f32 %v3719_v29, %v2538_v28  ;;  %v2673_v58 = vpop.f32.mrb[63].mxu0  ;;  %3729 = vmatpush3.bf16.msra.mxu1 %v2721_v47  ;;  %v2699_v42 = vmax.f32 %v2679_v26, 0.0  ;;  %v2799_v46 = vpop.permute.xlu1 %2798 }
 0x718   : > { %v2674_v55 = vadd.f32 %v2673_v58, %v2528_v13  ;;  %3730 = vmatprep.subr.bf16.mxu1 %v2722_v5  ;;  %v2697_v32 = vmax.f32 %v2671_v54, 0.0 }
 0x719   : > { %v2700_v31 = vmax.f32 %v2682_v23, 0.0 }
 0x71a   : > { %v2698_v61 = vmax.f32 %v2674_v55, 0.0  ;;  %v2784_v20 = vpop.permute.xlu0 %2783 }
 0x71b   : > { %v2724_v33 = vpack.c.bf16 %v2700_v31, %v2699_v42  ;;  %3731 = vmatpush3.bf16.msra.mxu1 %v2722_v5  ;;  %v2809_v58 = vpop.permute.xlu1 %2808 }
 0x71c   : > { %v2723_v36 = vpack.c.bf16 %v2698_v61, %v2697_v32 }
 0x71e   : > { %3732 = vmatprep.subr.bf16.mxu1 %v2723_v36  ;;  %v2794_v9 = vpop.permute.xlu0 %2793 }
 0x71f   : > { %3733 = vmatpush3.bf16.msra.mxu1 %v2723_v36 }
 0x720   : > { %3734 = vmatprep.subr.bf16.mxu1 %v2724_v33 }
 0x722   : > { %v2804_v27 = vpop.permute.xlu0 %2803 }
 0x723   : > { %3735 = vmatpush3.bf16.msra.mxu1 %v2724_v33 }
 0x726   : > { %3737 = vmatmul.mubr.bf16.vlgmr.msra.gmra.mrb[48].mxu1 %v3891_v37  ;;  %v2814_v36 = vpop.permute.xlu0 %2813 }
 0x727   : > { %3740 = vmatprep.mubr.bf16.mxu1 %v3892_v35 }
 0x72e   : > { %3741 = vmatmul.mubr.bf16.gmra.mrb[52].mxu1 %v3893_v39 }
 0x72f   : > { %3744 = vmatprep.mubr.bf16.mxu1 %v3894_v40 }
 0x736   : > { %3745 = vmatmul.mubr.bf16.gmra.mrb[56].mxu1 %v3895_v43  ;;  %v2819_v43 = vpop.permute.xlu1 %2818 }
 0x737   : > { %3748 = vmatprep.mubr.bf16.mxu1 %v3896_v34 }
 0x73e   : > { %3749 = vmatmul.mubr.bf16.gmra.mrb[60].mxu1 %v3897_v41 }
 0x7f9   : > { %v3738_v52 = vpop.f32.mrb[48].mxu1 }
 0x7fa   : > { %v2912_v0 = vadd.f32 %v3738_v52, %v2754_v4  ;;  %v2903_v2 = vpop.f32.mrb[49].mxu1 }
 0x7fb   : > { %v2904_v7 = vadd.f32 %v2903_v2, %v2744_v49  ;;  %v3739_v56 = vpop.f32.mrb[50].mxu1  ;;  %v3900_v2 = vld [vmem:[%s4950_s17 + $0x10] sm:$0xff]  }
 0x7fc   : > { %v2915_v44 = vadd.f32 %v3739_v56, %v2759_v10  ;;  %v2906_v57 = vpop.f32.mrb[51].mxu1  ;;  %v2968_v25 = vmax.f32 %v2912_v0, 0.0  ;;  %v3899_v0 = vld [vmem:[%s4950_s17 + $0x8] sm:$0xff]   ;;  %v3009_v56 = vpop.permute.xlu0 %3008 }
 0x7fd   : > { %v2907_v1 = vadd.f32 %v2906_v57, %v2749_v14  ;;  %v2966_v60 = vmax.f32 %v2904_v7, 0.0  ;;  %v3967_v7 = vmov 0.0  }
 0x7fe   : > { %v2969_v59 = vmax.f32 %v2915_v44, 0.0  ;;  %v3014_v44 = vpop.permute.xlu1 %3013 }
 0x7ff   : > { %v2967_v62 = vmax.f32 %v2907_v1, 0.0 }
 0x800   : > { %v2991_v30 = vpack.c.bf16 %v2969_v59, %v2968_v25  ;;  %v3019_v57 = vpop.permute.xlu0 %3018 }
 0x801   : > { %v2990_v19 = vpack.c.bf16 %v2967_v62, %v2966_v60  ;;  %v3742_v21 = vpop.f32.mrb[52].mxu1 }
 0x802   : > { %v2928_v3 = vadd.f32 %v3742_v21, %v2774_v50  ;;  %v2919_v12 = vpop.f32.mrb[53].mxu1  ;;  %v3024_v1 = vpop.permute.xlu1 %3023 }
 0x803   : > { %v2920_v6 = vadd.f32 %v2919_v12, %v2764_v17  ;;  %v3743_v8 = vpop.f32.mrb[54].mxu1  ;;  %3752 = vmatprep.subr.bf16.mxu0 %v2990_v19 }
 0x804   : > { %v2931_v51 = vadd.f32 %v3743_v8, %v2779_v53  ;;  %v2922_v45 = vpop.f32.mrb[55].mxu1  ;;  %3753 = vmatpush3.bf16.msra.mxu0 %v2990_v19  ;;  %v2972_v48 = vmax.f32 %v2928_v3, 0.0  ;;  %v3901_v53 = vld [vmem:[%s4950_s17 + $0x18] sm:$0xff]   ;;  %v3029_v60 = vpop.permute.xlu0 %3028 }
 0x805   : > { %v2923_v13 = vadd.f32 %v2922_v45, %v2769_v11  ;;  %3754 = vmatprep.subr.bf16.mxu0 %v2991_v30  ;;  %v2970_v16 = vmax.f32 %v2920_v6, 0.0 }
 0x806   : > { %v2973_v15 = vmax.f32 %v2931_v51, 0.0  ;;  %v3034_v21 = vpop.permute.xlu1 %3033 }
 0x807   : > { %v2971_v18 = vmax.f32 %v2923_v13, 0.0 }
 0x808   : > { %v2993_v5 = vpack.c.bf16 %v2973_v15, %v2972_v48  ;;  %3755 = vmatpush3.bf16.msra.mxu0 %v2991_v30 }
 0x809   : > { %v2992_v22 = vpack.c.bf16 %v2971_v18, %v2970_v16  ;;  %v3746_v47 = vpop.f32.mrb[56].mxu1 }
 0x80a   : > { %v2944_v24 = vadd.f32 %v3746_v47, %v2794_v9  ;;  %v2935_v26 = vpop.f32.mrb[57].mxu1  ;;  %v3039_v9 = vpop.permute.xlu0 %3038 }
 0x80b   : > { %v2936_v28 = vadd.f32 %v2935_v26, %v2784_v20  ;;  %v3747_v54 = vpop.f32.mrb[58].mxu1  ;;  %3756 = vmatprep.subr.bf16.mxu0 %v2992_v22  ;;  %v3044_v16 = vpop.permute.xlu1 %3043 }
 0x80c   : > { %v2947_v29 = vadd.f32 %v3747_v54, %v2799_v46  ;;  %v2938_v23 = vpop.f32.mrb[59].mxu1  ;;  %3757 = vmatpush3.bf16.msra.mxu0 %v2992_v22  ;;  %v2976_v42 = vmax.f32 %v2944_v24, 0.0 }
 0x80d   : > { %v2939_v55 = vadd.f32 %v2938_v23, %v2789_v63  ;;  %3758 = vmatprep.subr.bf16.mxu0 %v2993_v5  ;;  %v2974_v32 = vmax.f32 %v2936_v28, 0.0 }
 0x80e   : > { %v2977_v31 = vmax.f32 %v2947_v29, 0.0 }
 0x80f   : > { %v2975_v61 = vmax.f32 %v2939_v55, 0.0  ;;  %v3152_v55 = vpop.permute.xlu0 %3151 }
 0x810   : > { %v2995_v33 = vpack.c.bf16 %v2977_v31, %v2976_v42  ;;  %3759 = vmatpush3.bf16.msra.mxu0 %v2993_v5 }
 0x811   : > { %v2994_v37 = vpack.c.bf16 %v2975_v61, %v2974_v32  ;;  %v3750_v35 = vpop.f32.mrb[60].mxu1 }
 0x812   : > { %v2960_v39 = vadd.f32 %v3750_v35, %v2814_v36  ;;  %v2951_v40 = vpop.f32.mrb[61].mxu1 }
 0x813   : > { %v2952_v34 = vadd.f32 %v2951_v40, %v2804_v27  ;;  %v3751_v41 = vpop.f32.mrb[62].mxu1  ;;  %3760 = vmatprep.subr.bf16.mxu0 %v2994_v37 }
 0x814   : > { %v2963_v38 = vadd.f32 %v3751_v41, %v2819_v43  ;;  %v2954_v49 = vpop.f32.mrb[63].mxu1  ;;  %3761 = vmatpush3.bf16.msra.mxu0 %v2994_v37  ;;  %v2980_v4 = vmax.f32 %v2960_v39, 0.0 }
 0x815   : > { %v2955_v14 = vadd.f32 %v2954_v49, %v2809_v58  ;;  %3762 = vmatprep.subr.bf16.mxu0 %v2995_v33  ;;  %v2978_v17 = vmax.f32 %v2952_v34, 0.0  ;;  %v3143_v58 = vld [vmem:[%s4952_s19] sm:$0xf] }
 0x816   : > { %v2981_v10 = vmax.f32 %v2963_v38, 0.0 }
 0x817   : > { %v2979_v11 = vmax.f32 %v2955_v14, 0.0 }
 0x818   : > { %v2997_v50 = vpack.c.bf16 %v2981_v10, %v2980_v4  ;;  %3763 = vmatpush3.bf16.msra.mxu0 %v2995_v33 }
 0x819   : > { %v2996_v52 = vpack.c.bf16 %v2979_v11, %v2978_v17 }
 0x81b   : > { %3764 = vmatprep.subr.bf16.mxu0 %v2996_v52 }
 0x81c   : > { %3765 = vmatpush3.bf16.msra.mxu0 %v2996_v52 }
 0x81d   : > { %3766 = vmatprep.subr.bf16.mxu0 %v2997_v50 }
 0x820   : > { %3767 = vmatpush3.bf16.msra.mxu0 %v2997_v50 }
 0x821   : > { %3776 = vmatprep.subr.bf16.mxu0 %v3967_v7 }
 0x823   : > { %3769 = vmatmul.mubr.bf16.vlgmr.msra.gmra.mrb[64].mxu0 %v3899_v0 }
 0x824   : > { %3772 = vmatprep.mubr.bf16.mxu0 %v3900_v2 }
 0x82b   : > { %3773 = vmatmul.mubr.bf16.gmra.mrb[68].mxu0 %v3901_v53 }
 0x82c   : > { %3784 = vmatprep.mubr.msk.bf16.mxu0 %vm3968_vm1, %v3967_v7 }
 0x8f6   : > { %v3770_v25 = vpop.f32.mrb[64].mxu0 }
 0x8f7   : > { %v3113_v59 = vadd.f32 %v3770_v25, %v3019_v57  ;;  %v3104_v20 = vpop.f32.mrb[65].mxu0 }
 0x8f8   : > { %v3105_v62 = vadd.f32 %v3104_v20, %v3009_v56  ;;  %v3771_v30 = vpop.f32.mrb[66].mxu0 }
 0x8f9   : > { %v3116_v63 = vadd.f32 %v3771_v30, %v3024_v1  ;;  %v3107_v19 = vpop.f32.mrb[67].mxu0  ;;  %v3137_v12 = vmax.f32 %v3113_v59, 0.0 }
 0x8fa   : > { %v3108_v3 = vadd.f32 %v3107_v19, %v3014_v44  ;;  %v3135_v8 = vmax.f32 %v3105_v62, 0.0 }
 0x8fb   : > { %v3138_v6 = vmax.f32 %v3116_v63, 0.0 }
 0x8fc   : > { %v3136_v51 = vmax.f32 %v3108_v3, 0.0 }
 0x8fd   : > { %v3145_v45 = vpack.c.bf16 %v3138_v6, %v3137_v12 }
 0x8fe   : > { %v3144_v13 = vpack.c.bf16 %v3136_v51, %v3135_v8  ;;  %v3774_v48 = vpop.f32.mrb[68].mxu0 }
 0x8ff   : > { %v3129_v15 = vadd.f32 %v3774_v48, %v3039_v9  ;;  %v3120_v46 = vpop.f32.mrb[69].mxu0 }
 0x900   : > { %v3121_v18 = vadd.f32 %v3120_v46, %v3029_v60  ;;  %v3775_v5 = vpop.f32.mrb[70].mxu0  ;;  %3777 = vmatpush3.bf16.msra.mxu0 %v3144_v13 }
 0x901   : > { %v3132_v22 = vadd.f32 %v3775_v5, %v3044_v16  ;;  %v3123_v47 = vpop.f32.mrb[71].mxu0  ;;  %3778 = vmatprep.subr.bf16.mxu0 %v3967_v7  ;;  %v3141_v26 = vmax.f32 %v3129_v15, 0.0 }
 0x902   : > { %v3124_v24 = vadd.f32 %v3123_v47, %v3034_v21  ;;  %v3139_v28 = vmax.f32 %v3121_v18, 0.0 }
 0x903   : > { %v3142_v27 = vmax.f32 %v3132_v22, 0.0 }
 0x904   : > { %v3140_v54 = vmax.f32 %v3124_v24, 0.0  ;;  %3779 = vmatpush3.bf16.msra.mxu0 %v3145_v45 }
 0x905   : > { %v3147_v29 = vpack.c.bf16 %v3142_v27, %v3141_v26  ;;  %3780 = vmatprep.subr.bf16.mxu0 %v3967_v7 }
 0x906   : > { %v3146_v23 = vpack.c.bf16 %v3140_v54, %v3139_v28 }
 0x908   : > { %3781 = vmatpush3.bf16.msra.mxu0 %v3146_v23 }
 0x909   : > { %3782 = vmatprep.subr.bf16.mxu0 %v3967_v7 }
 0x90c   : > { %3783 = vmatpush3.bf16.msra.mxu0 %v3147_v29 }
 0x90f   : > { %3785 = vmatmul.mubr.msk.bf16.vlgmr.msra.gmra.mrb[72].mxu0 %vm3154_vm2, %v3143_v58 }
 0x9e2   : > { %v3192_v42 = vpop.f32.mrb[72].mxu0 }
 0x9e3   : > { %v3193_v31 = vadd.f32 %v3192_v42, %v3152_v55  ;;  %v3786_v32 = vpop.f32.mrb[73].mxu0 }
 0x9e4   : > { %v3195_v61 = vpop.f32.mrb[74].mxu0 }
 0x9e5   : > { %3198 = vst [vmem:[%s707_s21] sm:$0xff] %v3193_v31  ;;  %v3787_v33 = vpop.f32.mrb[75].mxu0 }
 0x9e6   : > { %3915 = shalt.err (!%p3912_p5)
}
 0x9e7   : > { %s3916_s30 = scalar_lea.hbm %s4889_s4, 128  ;;  %s3920_s26 = scalar_lea.hbm %s4999_s3, 256 }
 0x9e8   : > { %p3917_p7 = scmp.ne.s32.totalorder %s4889_s4, %s3916_s30  ;;  %p3921_p12 = scmp.lt.u32.totalorder %s4889_s4, %s4999_s3 }
 0x9e9   : > { %p3922_p13 = scmp.lt.u32.totalorder %s3920_s26, %s3916_s30  ;;  %p3924_p1 = scmp.lt.u32.totalorder %s3916_s30, %s4889_s4 }
 0x9ea   : > { %p3918_p10 = pnand %p3917_p7, %p4118_p6 }
 0x9eb   : > { %p3923_p0 = por %p3922_p13, %p3921_p12 }
 0x9ec   : > { %p3919_p11 = pneg %p3918_p10 }
 0x9ed   : > { %p3925_p2 = por %p3924_p1, %p3923_p0 }
 0x9ef   : > { %p3926_p3 = pnand %p3925_p2, %p3919_p11 }
 0x9f1   : > { %3929 = shalt.err (!%p3926_p3)
}
 0x9f2   : > { %3788 = dma.vmem_to_hbm [thread:$0]  (%p4118_p6), %s4891_s2, 128, %s4889_s4, %s3200_s29  }
 0x9f3 PF: > { %s5000_s23 = sld [smem:[#allocation6_spill]]  ;;  %p3791_p4 = pnand %p3280_p9, %p4122_p8 }
 0x9f9   : > { %s3225_s25 = sand.u32 1, %s5000_s23  }
 0x9fa   : > { %s3226_s21 = scalar_lea.sflag [#allocation4], %s3225_s25 }
 0x9fb   : > { %3947 = dma.done.wait (!%p3791_p4), %s3226_s21, 128  }
 0x9fc   : > { %3949 = vsyncadd (!%p3791_p4), %s3226_s21, 4294967168  ;;  %s5002_s27 = sld [smem:[#allocation9_spill]]  ;;  %s5003_s2 = sld [smem:[#allocation7_spill]] }
 0x9fd   : > { %s5004_s25 = sld [smem:[#allocation8_spill]]  ;;  %s5005_s26 = sld [smem:[#allocation10_spill]] }
 0xa02   : > { %p31_p5 = scmp.ge.s32.totalorder %s5002_s27, 4  }
 0xa04   :  { %33 = sbr.rel (!%p31_p5) target bundleno = 11 (0xb), region = 185 }
 0xa0b   :  { %3231 = vsyncpa [#allocation4], 1 }
 0xa0c   :  { %3233 = vsyncpa [#allocation4 + $0x1], 1 }

</bundles_post_ra>
